<compile_context>
chip_gen: v6e
topology: v6e:2x2x1
jax: 0.10.0
libtpu: 0.0.40
codegen_flags: <defaults>
</compile_context>

<pallas_src>
import numpy as np

import jax
import jax.numpy as jnp
from jax.experimental import pallas as pl
from jax.experimental.pallas import tpu as pltpu

_LANE = 128
# Smallest default scoped-VMEM across generations (v5e = 16 MiB); only above
# this do we explicitly request a larger limit (clamped to v7x's 64 MiB part).
_DEFAULT_SCOPED_VMEM = 16 << 20
_MAX_VMEM_LIMIT = 64 << 20


def _vmem_limit(bytes_needed):
    """Return a vmem_limit_bytes value (or None) for CompilerParams."""
    if bytes_needed <= _DEFAULT_SCOPED_VMEM:
        return None
    return int(min(bytes_needed * 3 // 2, _MAX_VMEM_LIMIT))


# ---------------------------------------------------------------------------
# Path A: tables resident in VMEM, gather fused into the kernel (one-hot MXU).
# ---------------------------------------------------------------------------
def _fused_gather_kernel(ut_ref, it_ref, u_ref, i_ref, o_ref):
    """In-kernel embedding gather + dot + sigmoid.

    ut_ref: (D, NU) transposed user table, resident in VMEM (fetched once)
    it_ref: (D, NI) transposed item table, resident in VMEM (fetched once)
    u_ref : (1, tb) int32 user ids for this batch tile (batch on lanes)
    i_ref : (1, tb) int32 item ids
    o_ref : (1, tb) f32   sigmoid scores (lane-dense, unmasked vst)
    """
    nu = ut_ref.shape[1]
    ni = it_ref.shape[1]
    tb = u_ref.shape[1]

    u_ids = u_ref[...]                                              # (1, tb)
    i_ids = i_ref[...]

    # Exact 0/1 one-hot selection matrices, batch on the lane axis.
    u_oh = jnp.where(
        jax.lax.broadcasted_iota(jnp.int32, (nu, tb), 0) == u_ids, 1.0, 0.0
    ).astype(jnp.float32)
    i_oh = jnp.where(
        jax.lax.broadcasted_iota(jnp.int32, (ni, tb), 0) == i_ids, 1.0, 0.0
    ).astype(jnp.float32)

    # Row gather on the (otherwise idle) MXU; HIGHEST precision keeps the
    # selection f32-exact (no bf16 truncation of the table values).
    ue = jnp.dot(ut_ref[...].astype(jnp.float32), u_oh,
                 preferred_element_type=jnp.float32,
                 precision=jax.lax.Precision.HIGHEST)               # (D, tb)
    ie = jnp.dot(it_ref[...].astype(jnp.float32), i_oh,
                 preferred_element_type=jnp.float32,
                 precision=jax.lax.Precision.HIGHEST)               # (D, tb)

    scores = jnp.sum(ue * ie, axis=0, keepdims=True)                # (1, tb)
    o_ref[...] = jax.nn.sigmoid(scores)                             # EUP


# ---------------------------------------------------------------------------
# Path B: big tables -> XLA gather glue (bf16 storage, allow_input_fusion).
# ---------------------------------------------------------------------------
def _pregathered_kernel(ue_ref, ie_ref, o_ref):
    """ue_ref/ie_ref: (D, tb) gathered tiles, batch on lanes. o_ref: (1, tb)."""
    ue = ue_ref[...].astype(jnp.float32)   # upcast: required on v5e for bf16
    ie = ie_ref[...].astype(jnp.float32)
    scores = jnp.sum(ue * ie, axis=0, keepdims=True)                # (1, tb)
    o_ref[...] = jax.nn.sigmoid(scores)


def puremf_forward(user_emb_table, item_emb_table, users, items, *,
                   tb=8192,
                   storage_dtype=jnp.bfloat16,
                   max_fused_table_bytes=8 << 20,
                   fused_working_set_bytes=12 << 20):
    """Pallas implementation of PureMF.forward.

    user_emb_table: (num_users, D) float32 embedding table
    item_emb_table: (num_items, D) float32 embedding table
    users, items:   (B,) integer indices
    tb:             batch tile (rounded to a multiple of 128)
    storage_dtype:  dtype of the gathered tiles on the big-table path
                    (bf16 default halves HBM bytes; compute is always f32)
    returns:        (B,) float32 sigmoid scores
    """
    B = int(users.shape[0])
    num_users, D = (int(s) for s in user_emb_table.shape)
    num_items = int(item_emb_table.shape[0])

    users = users.astype(jnp.int32)
    items = items.astype(jnp.int32)

    # ---- batch tiling (batch lives on the lane axis) ----------------------
    tb = max(_LANE, (int(tb) // _LANE) * _LANE)
    b_lane = pl.cdiv(B, _LANE) * _LANE
    tb_eff = min(tb, b_lane)
    # v7x has 2 TensorCores: give the "parallel" batch grid >= 2 steps when
    # the batch allows it so both cores get work (no-op on 1-TC v5e/v6e).
    if b_lane >= 2 * _LANE and pl.cdiv(b_lane, tb_eff) < 2:
        tb_eff = max(_LANE, (b_lane // 2 // _LANE) * _LANE)

    table_bytes = (num_users + num_items) * D * user_emb_table.dtype.itemsize
    use_fused_gather = table_bytes <= max_fused_table_bytes

    if use_fused_gather:
        # Keep the in-kernel working set (tables + one-hots + io tiles) well
        # inside VMEM on every generation (v7x: 64 MiB part, 32 MiB default).
        per_col = (num_users + num_items + 2 * D + 8) * 4
        tb_cap = max(_LANE, (fused_working_set_bytes // per_col) // _LANE * _LANE)
        tb_eff = min(tb_eff, tb_cap)

    b_pad = pl.cdiv(B, tb_eff) * tb_eff
    pad = b_pad - B
    users_p = jnp.pad(users, (0, pad))          # pad with index 0 (valid row)
    items_p = jnp.pad(items, (0, pad))
    grid = (b_pad // tb_eff,)

    if use_fused_gather:
        # ---- Path A: gather fused into the kernel --------------------------
        # Pad the row axis to a lane multiple (zero rows are never selected)
        # and pre-transpose so D sits on sublanes, rows on lanes.
        nu_pad = pl.cdiv(num_users, _LANE) * _LANE
        ni_pad = pl.cdiv(num_items, _LANE) * _LANE
        ut_t = jnp.pad(user_emb_table, ((0, nu_pad - num_users), (0, 0))).T
        it_t = jnp.pad(item_emb_table, ((0, ni_pad - num_items), (0, 0))).T

        vmem_bytes = (2 * (nu_pad + ni_pad) * D * 4        # resident tables
                      + 2 * 2 * tb_eff * 4                 # idx tiles (dbl-buf)
                      + 2 * tb_eff * 4                     # out tile (dbl-buf)
                      + (nu_pad + ni_pad + 2 * D) * tb_eff * 4)  # one-hots/acts
        flops = 2 * b_pad * D * (nu_pad + ni_pad) + 2 * b_pad * D
        bytes_accessed = (nu_pad + ni_pad) * D * 4 + 3 * b_pad * 4

        out = pl.pallas_call(
            _fused_gather_kernel,
            out_shape=jax.ShapeDtypeStruct((1, b_pad), jnp.float32),
            grid_spec=pl.GridSpec(
                grid=grid,
                in_specs=[
                    pl.BlockSpec((D, nu_pad), lambda i: (0, 0)),   # resident
                    pl.BlockSpec((D, ni_pad), lambda i: (0, 0)),   # resident
                    pl.BlockSpec((1, tb_eff), lambda i: (0, i)),
                    pl.BlockSpec((1, tb_eff), lambda i: (0, i)),
                ],
                out_specs=pl.BlockSpec((1, tb_eff), lambda i: (0, i)),
            ),
            compiler_params=pltpu.CompilerParams(
                dimension_semantics=("parallel",),
                vmem_limit_bytes=_vmem_limit(vmem_bytes),
            ),
            cost_estimate=pl.CostEstimate(
                flops=int(flops),
                transcendentals=int(b_pad),
                bytes_accessed=int(bytes_accessed)),
        )(ut_t, it_t, users_p.reshape(1, b_pad), items_p.reshape(1, b_pad))
        return out[0, :B]

    # ---- Path B: big tables -> XLA gather glue -----------------------------
    sdt = user_emb_table.dtype if storage_dtype is None else storage_dtype
    itemsize = int(np.dtype(sdt).itemsize)
    # Gather, cast to storage dtype and transpose so batch lands on lanes;
    # allow_input_fusion lets XLA fuse these producers into the pallas_call
    # inputs so the (B, D) activations are not round-tripped through HBM.
    ue_t = jnp.take(user_emb_table, users_p, axis=0).astype(sdt).T  # (D, b_pad)
    ie_t = jnp.take(item_emb_table, items_p, axis=0).astype(sdt).T  # (D, b_pad)

    vmem_bytes = 2 * 2 * D * tb_eff * itemsize + 2 * tb_eff * 4
    out = pl.pallas_call(
        _pregathered_kernel,
        out_shape=jax.ShapeDtypeStruct((1, b_pad), jnp.float32),
        grid_spec=pl.GridSpec(
            grid=grid,
            in_specs=[
                pl.BlockSpec((D, tb_eff), lambda i: (0, i)),
                pl.BlockSpec((D, tb_eff), lambda i: (0, i)),
            ],
            out_specs=pl.BlockSpec((1, tb_eff), lambda i: (0, i)),
        ),
        compiler_params=pltpu.CompilerParams(
            dimension_semantics=("parallel",),
            allow_input_fusion=[True, True],
            vmem_limit_bytes=_vmem_limit(vmem_bytes),
        ),
        cost_estimate=pl.CostEstimate(
            flops=2 * b_pad * D,
            transcendentals=b_pad,
            bytes_accessed=2 * b_pad * D * itemsize + b_pad * 4),
    )(ue_t, ie_t)
    return out[0, :B]


def reference_forward(user_emb_table, item_emb_table, users, items):
    ue = jnp.take(user_emb_table, users, axis=0)
    ie = jnp.take(item_emb_table, items, axis=0)
    return jax.nn.sigmoid(jnp.sum(ue * ie, axis=1))


if __name__ == "__main__":
    # Small deterministic configuration (dataset.n_users / m_items,
    # config['latent_dim_rec']).
    num_users = 64
    num_items = 100
    latent_dim = 32
    batch = 8

    key = jax.random.PRNGKey(0)
    k_user, k_item, k_u_idx, k_i_idx = jax.random.split(key, 4)

    # nn.Embedding default init: standard normal, mean 0 / std 1.
    embedding_user = jax.random.normal(k_user, (num_users, latent_dim), jnp.float32)
    embedding_item = jax.random.normal(k_item, (num_items, latent_dim), jnp.float32)

    users = jax.random.randint(k_u_idx, (batch,), 0, num_users, dtype=jnp.int32)
    items = jax.random.randint(k_i_idx, (batch,), 0, num_items, dtype=jnp.int32)

    ref = reference_forward(embedding_user, embedding_item, users, items)

    # Path A (default for small tables): fused in-kernel gather.
    out = puremf_forward(embedding_user, embedding_item, users, items)
    out = jax.block_until_ready(out)
    assert out.shape == (batch,), out.shape
    assert jnp.allclose(out, ref, atol=1e-3, rtol=1e-3), (out, ref)

    # Path B (big-table path), f32 storage: should match the f32 reference.
    out_b = puremf_forward(embedding_user, embedding_item, users, items,
                           max_fused_table_bytes=0, storage_dtype=None)
    out_b = jax.block_until_ready(out_b)
    assert jnp.allclose(out_b, ref, atol=1e-4, rtol=1e-4), (out_b, ref)

    # Path B with the default bf16 storage: compare against a matching
    # bf16-storage / f32-compute reference (tight tolerance).
    out_bf16 = puremf_forward(embedding_user, embedding_item, users, items,
                              max_fused_table_bytes=0)
    out_bf16 = jax.block_until_ready(out_bf16)
    ue_bf = jnp.take(embedding_user, users, axis=0).astype(jnp.bfloat16).astype(jnp.float32)
    ie_bf = jnp.take(embedding_item, items, axis=0).astype(jnp.bfloat16).astype(jnp.float32)
    ref_bf16 = jax.nn.sigmoid(jnp.sum(ue_bf * ie_bf, axis=1))
    assert jnp.allclose(out_bf16, ref_bf16, atol=1e-4, rtol=1e-4), (out_bf16, ref_bf16)

    print("KERNEL_OK")
</pallas_src>

<mosaic_0001>
module attributes {stable_mosaic.version = 11 : i64} {
  func.func @_fused_gather_kernel(%arg0: i32, %arg1: memref<32x128xf32, #tpu.memory_space<vmem>>, %arg2: memref<32x128xf32, #tpu.memory_space<vmem>>, %arg3: memref<1x128xi32, #tpu.memory_space<vmem>>, %arg4: memref<1x128xi32, #tpu.memory_space<vmem>>, %arg5: memref<1x128xf32, #tpu.memory_space<vmem>>) attributes {dimension_semantics = [#tpu.dimension_semantics<parallel>], iteration_bounds = array<i64: 1>, scalar_prefetch = 0 : i64, scratch_operands = 0 : i64, tpu.core_type = #tpu.core_type<tc>, window_params = [{pipeline_mode = #tpu.pipeline_mode<synchronous>, transform_indices = @transform_0, window_bounds = array<i64: 32, 128>}, {pipeline_mode = #tpu.pipeline_mode<synchronous>, transform_indices = @transform_1, window_bounds = array<i64: 32, 128>}, {transform_indices = @transform_2, window_bounds = array<i64: 1, 128>}, {transform_indices = @transform_3, window_bounds = array<i64: 1, 128>}, {transform_indices = @transform_4, window_bounds = array<i64: 1, 128>}]} {
    %c0 = arith.constant 0 : index
    %c0_0 = arith.constant 0 : index
    %0 = vector.load %arg3[%c0, %c0_0] : memref<1x128xi32, #tpu.memory_space<vmem>>, vector<1x128xi32>
    %c0_1 = arith.constant 0 : index
    %c0_2 = arith.constant 0 : index
    %1 = vector.load %arg4[%c0_1, %c0_2] : memref<1x128xi32, #tpu.memory_space<vmem>>, vector<1x128xi32>
    %2 = tpu.iota {dimensions = array<i32: 0>} : vector<128x128xi32>
    %3 = vector.broadcast %0 : vector<1x128xi32> to vector<128x128xi32>
    %4 = arith.cmpi eq, %2, %3 : vector<128x128xi32>
    %cst = arith.constant 1.000000e+00 : f32
    %cst_3 = arith.constant 0.000000e+00 : f32
    %5 = vector.broadcast %cst : f32 to vector<128x128xf32>
    %6 = vector.broadcast %cst_3 : f32 to vector<128x128xf32>
    %7 = arith.select %4, %5, %6 : vector<128x128xi1>, vector<128x128xf32>
    %8 = tpu.iota {dimensions = array<i32: 0>} : vector<128x128xi32>
    %9 = vector.broadcast %1 : vector<1x128xi32> to vector<128x128xi32>
    %10 = arith.cmpi eq, %8, %9 : vector<128x128xi32>
    %cst_4 = arith.constant 1.000000e+00 : f32
    %cst_5 = arith.constant 0.000000e+00 : f32
    %11 = vector.broadcast %cst_4 : f32 to vector<128x128xf32>
    %12 = vector.broadcast %cst_5 : f32 to vector<128x128xf32>
    %13 = arith.select %10, %11, %12 : vector<128x128xi1>, vector<128x128xf32>
    %c0_6 = arith.constant 0 : index
    %c0_7 = arith.constant 0 : index
    %14 = vector.load %arg1[%c0_6, %c0_7] : memref<32x128xf32, #tpu.memory_space<vmem>>, vector<32x128xf32>
    %cst_8 = arith.constant dense<0.000000e+00> : vector<32x128xf32>
    %15 = tpu.matmul %14, %7, %cst_8 {dimension_numbers = #tpu.dot_dimension_numbers<[1], [0], [0], [1], [0, 0, 1, 1], [], []>, precision = #tpu.contract_precision<fp32>} : vector<32x128xf32>, vector<128x128xf32>, vector<32x128xf32> -> vector<32x128xf32>
    %c0_9 = arith.constant 0 : index
    %c0_10 = arith.constant 0 : index
    %16 = vector.load %arg2[%c0_9, %c0_10] : memref<32x128xf32, #tpu.memory_space<vmem>>, vector<32x128xf32>
    %cst_11 = arith.constant dense<0.000000e+00> : vector<32x128xf32>
    %17 = tpu.matmul %16, %13, %cst_11 {dimension_numbers = #tpu.dot_dimension_numbers<[1], [0], [0], [1], [0, 0, 1, 1], [], []>, precision = #tpu.contract_precision<fp32>} : vector<32x128xf32>, vector<128x128xf32>, vector<32x128xf32> -> vector<32x128xf32>
    %18 = arith.mulf %15, %17 : vector<32x128xf32>
    %cst_12 = arith.constant dense<0.000000e+00> : vector<128xf32>
    %19 = vector.multi_reduction <add>, %18, %cst_12 [0] : vector<32x128xf32> to vector<128xf32>
    %20 = vector.shape_cast %19 : vector<128xf32> to vector<1x128xf32>
    %21 = arith.negf %20 : vector<1x128xf32>
    %22 = math.exp %21 : vector<1x128xf32>
    %cst_13 = arith.constant 1.000000e+00 : f32
    %23 = vector.broadcast %cst_13 : f32 to vector<1x128xf32>
    %24 = arith.addf %23, %22 : vector<1x128xf32>
    %25 = arith.divf %23, %24 : vector<1x128xf32>
    %c0_14 = arith.constant 0 : index
    %c0_15 = arith.constant 0 : index
    %26 = vector.load %arg5[%c0_14, %c0_15] : memref<1x128xf32, #tpu.memory_space<vmem>>, vector<1x128xf32>
    tpu.vector_store %arg5[%c0_14, %c0_15], %25 {strides = array<i32>} : memref<1x128xf32, #tpu.memory_space<vmem>>, vector<1x128xf32>,
    return
  }
  func.func @transform_0(%arg0: i32) -> (i32, i32) {
    %c0_i32 = arith.constant 0 : i32
    %c0_i32_0 = arith.constant 0 : i32
    %c0_i32_1 = arith.constant 0 : i32
    return %c0_i32, %c0_i32_0 : i32, i32
  }
  func.func @transform_1(%arg0: i32) -> (i32, i32) {
    %c0_i32 = arith.constant 0 : i32
    %c0_i32_0 = arith.constant 0 : i32
    %c0_i32_1 = arith.constant 0 : i32
    return %c0_i32, %c0_i32_0 : i32, i32
  }
  func.func @transform_2(%arg0: i32) -> (i32, i32) {
    %c0_i32 = arith.constant 0 : i32
    %c0_i32_0 = arith.constant 0 : i32
    return %c0_i32, %arg0 : i32, i32
  }
  func.func @transform_3(%arg0: i32) -> (i32, i32) {
    %c0_i32 = arith.constant 0 : i32
    %c0_i32_0 = arith.constant 0 : i32
    return %c0_i32, %arg0 : i32, i32
  }
  func.func @transform_4(%arg0: i32) -> (i32, i32) {
    %c0_i32 = arith.constant 0 : i32
    %c0_i32_0 = arith.constant 0 : i32
    return %c0_i32, %arg0 : i32, i32
  }
}

</mosaic_0001>

<bundles_post_ra>
// kernel: tpu_custom_call.1
= control target key start
LH: loop header
LB: loop body
LE: loop exit
PB: predicated region body
PF: predicated region fallthrough
CT: control target
= control target key end

     0   :  { %9 = vsyncpa [#allocation3], 0  ;;  %s3841_s0 = inlined_call_operand.hbm [shape: f32[32,128], index: 0, kind: input, shape index: {}]   ;;  %s3842_s1 = inlined_call_operand.hbm [shape: f32[32,128], index: 1, kind: input, shape index: {}]   ;;  %s3843_s2 = inlined_call_operand.vmem [shape: s32[1,128], index: 2, kind: input, shape index: {}]   ;;  %s3844_s3 = inlined_call_operand.vmem [shape: s32[1,128], index: 3, kind: input, shape index: {}]   ;;  %s3845_s4 = inlined_call_operand.hbm [shape: f32[1,128], index: 4, kind: output, shape index: {}]  }
   0x1   :  { %10 = vsyncpa [#allocation6], 0 }
   0x2   :  { %11 = vsyncpa [#allocation4], 0  ;;  %s2401_s15 = smov [#allocation2]  }
   0x3   :  { %s17_s16 = sshll.u32 %s2401_s15, 4  ;;  %s18_s16 = int_to_ptr.vmem [resolvable:$true] %s17_s16 }
   0x4   :  { %s2343_s17 = scalar_lea.vmem %s18_s16, 512  ;;  %p2348_p1 = scmp.lt.s32.totalorder %s18_s16, %s18_s16 }
   0x5   :  { %p2344_p0 = scmp.ne.s32.totalorder %s18_s16, %s2343_s17  ;;  %p2349_p2 = scmp.lt.s32.totalorder %s2343_s17, %s2343_s17 }
   0x7   :  { %p2350_p3 = por %p2349_p2, %p2348_p1 }
   0x9   :  { %p2351_p4 = pnand %p2350_p3, %p2344_p0 }
   0xb   :  { %2354 = shalt.err (!%p2351_p4)
}
   0xc   :  { %s2402_s18 = smov 128   ;;  %s2403_s19 = smov 8  }
   0xd   :  { %23 = dma.hbm_to_vmem [thread:$0]  %s3841_s0, 512, %s18_s16, [#allocation3], %s2402_s18, %s2402_s18, %s2403_s19  }
   0xe   :  { %s2404_s22 = smov [#allocation5]  }
   0xf   :  { %s29_s23 = sshll.u32 %s2404_s22, 4  ;;  %s30_s23 = int_to_ptr.vmem [resolvable:$true] %s29_s23 }
  0x10   :  { %s2363_s24 = scalar_lea.vmem %s30_s23, 512  ;;  %p2368_p6 = scmp.lt.s32.totalorder %s30_s23, %s30_s23 }
  0x11   :  { %p2364_p5 = scmp.ne.s32.totalorder %s30_s23, %s2363_s24  ;;  %p2369_p7 = scmp.lt.s32.totalorder %s2363_s24, %s2363_s24 }
  0x13   :  { %p2370_p8 = por %p2369_p7, %p2368_p6 }
  0x15   :  { %p2371_p9 = pnand %p2370_p8, %p2364_p5 }
  0x17   :  { %2374 = shalt.err (!%p2371_p9)
}
  0x18   :  { %35 = dma.hbm_to_vmem [thread:$0]  %s3842_s1, 512, %s30_s23, [#allocation6], %s2402_s18, %s2402_s18, %s2403_s19  }
  0x19   :  { %2395 = dma.done.wait [#allocation3], 512  }
  0x1a   :  { %2396 = vsyncadd [#allocation3], 4294966784 }
  0x1b   :  { %2397 = dma.done.wait [#allocation6], 512  }
  0x1c   :  { %2398 = vsyncadd [#allocation6], 4294966784  ;;  %v48_v0 = vlaneseq  ;;  %v2465_v9 = vld [vmem:[%s3843_s2] ss:$0 sm:$0xff]  ;;  %v2405_v18 = vmov 1.0   ;;  %v3846_v20 = vmov 0.0  }
  0x1e   :  { %v2439_v1 = vshrl.u32 %v48_v0, 7 }
  0x20   :  { %3865 = vst [vmem:[#allocation11_spill] sm:$0xff] %v2439_v1  ;;  %v2442_v2 = vadd.s32 120, %v2439_v1  ;;  %v2445_v3 = vadd.s32 112, %v2439_v1  ;;  %v2448_v4 = vadd.s32 104, %v2439_v1  ;;  %v2451_v5 = vadd.s32 96, %v2439_v1 }
  0x21   :  { %v2454_v6 = vadd.s32 88, %v2439_v1  ;;  %v2457_v7 = vadd.s32 80, %v2439_v1  ;;  %v2460_v8 = vadd.s32 72, %v2439_v1  ;;  %v2468_v10 = vadd.s32 64, %v2439_v1 }
  0x22   :  { %3866 = vst [vmem:[#allocation12_spill] sm:$0xff] %v2445_v3  ;;  %3867 = vst [vmem:[#allocation13_spill] sm:$0xff] %v2448_v4  ;;  %v2471_v11 = vadd.s32 56, %v2439_v1  ;;  %v2474_v12 = vadd.s32 48, %v2439_v1  ;;  %v2477_v13 = vadd.s32 40, %v2439_v1  ;;  %vm2481_vm0 = vcmp.eq.s32.totalorder %v2442_v2, %v2465_v9 }
  0x23   :  { %3868 = vst [vmem:[#allocation14_spill] sm:$0xff] %v2451_v5  ;;  %3869 = vst [vmem:[#allocation15_spill] sm:$0xff] %v2454_v6  ;;  %vm2487_vm1 = vcmp.eq.s32.totalorder %v2445_v3, %v2465_v9  ;;  %vm2493_vm2 = vcmp.eq.s32.totalorder %v2448_v4, %v2465_v9  ;;  %vm2499_vm3 = vcmp.eq.s32.totalorder %v2451_v5, %v2465_v9  ;;  %1868 = vmatprep.subr.msk.mxu0 %vm2481_vm0, %v2405_v18 }
  0x24   :  { %3870 = vst [vmem:[#allocation16_spill] sm:$0xff] %v2457_v7  ;;  %3871 = vst [vmem:[#allocation17_spill] sm:$0xff] %v2460_v8  ;;  %vm2508_vm4 = vcmp.eq.s32.totalorder %v2454_v6, %v2465_v9  ;;  %v100_v21 = vsel %vm2481_vm0, 1.0, %v3846_v20  ;;  %v99_v22 = vsel %vm2487_vm1, 1.0, %v3846_v20  ;;  %v2519_v23 = vadd.s32 32, %v2439_v1  ;;  %1869 = vmatpush3.msk.msra.mxu0 %vm2481_vm0, %v2405_v18 }
  0x25   :  { %3872 = vst [vmem:[#allocation18_spill] sm:$0xff] %v2468_v10  ;;  %3873 = vst [vmem:[#allocation19_spill] sm:$0xff] %v2471_v11  ;;  %v2524_v24 = vsub.f32 %v100_v21, %v100_v21  ;;  %vm2528_vm5 = vcmp.eq.s32.totalorder %v2457_v7, %v2465_v9  ;;  %v2532_v26 = vsub.f32 %v99_v22, %v99_v22  ;;  %v98_v27 = vsel %vm2493_vm2, 1.0, %v3846_v20 }
  0x26   :  { %3874 = vst [vmem:[#allocation20_spill] sm:$0xff] %v2474_v12  ;;  %3875 = vst [vmem:[#allocation21_spill] sm:$0xff] %v2477_v13  ;;  %1870 = vmatprep.subr.msk.mxu0 %vm2487_vm1, %v2405_v18  ;;  %vm2542_vm6 = vcmp.eq.s32.totalorder %v2460_v8, %v2465_v9  ;;  %v2546_v29 = vsub.f32 %v98_v27, %v98_v27  ;;  %v97_v30 = vsel %vm2499_vm3, 1.0, %v3846_v20  ;;  %v2552_v31 = vadd.s32 24, %v2439_v1 }
  0x27   :  { %3886 = vst [vmem:[#allocation22_spill] sm:$0xff] %v2519_v23  ;;  %1871 = vmatpush3.msk.msra.mxu0 %vm2487_vm1, %v2405_v18  ;;  %v2558_v32 = vand.u32 4294901760, %v2524_v24  ;;  %v2561_v33 = vand.u32 4294901760, %v2532_v26  ;;  %v2563_v34 = vsub.f32 %v97_v30, %v97_v30  ;;  %v96_v35 = vsel %vm2508_vm4, 1.0, %v3846_v20 }
  0x28   :  { %3891 = vst [vmem:[#allocation23_spill] sm:$0xff] %v2552_v31  ;;  %1872 = vmatprep.subr.msk.mxu0 %vm2493_vm2, %v2405_v18  ;;  %v2572_v36 = vand.u32 4294901760, %v2546_v29  ;;  %vm2576_vm7 = vcmp.eq.s32.totalorder %v2468_v10, %v2465_v9  ;;  %v2580_v38 = vsub.f32 %v96_v35, %v96_v35  ;;  %v95_v39 = vsel %vm2528_vm5, 1.0, %v3846_v20 }
  0x29   :  { %1873 = vmatpush3.msk.msra.mxu0 %vm2493_vm2, %v2405_v18  ;;  %v249_v40 = vsub.f32 %v2524_v24, %v2558_v32  ;;  %v255_v41 = vsub.f32 %v2532_v26, %v2561_v33  ;;  %v2593_v42 = vand.u32 4294901760, %v2563_v34  ;;  %v2595_v43 = vsub.f32 %v95_v39, %v95_v39  ;;  %v3919_v15 = vld [vmem:[#allocation12_spill] sm:$0xff]  ;;  %v3923_v19 = vld [vmem:[#allocation13_spill] sm:$0xff] }
  0x2a   :  { %1874 = vmatprep.subr.msk.mxu0 %vm2499_vm3, %v2405_v18  ;;  %v261_v44 = vsub.f32 %v2546_v29, %v2572_v36  ;;  %vm2604_vm8 = vcmp.eq.s32.totalorder %v2471_v11, %v2465_v9  ;;  %v2609_v46 = vand.u32 4294901760, %v2580_v38  ;;  %v94_v47 = vsel %vm2542_vm6, 1.0, %v3846_v20 }
  0x2b   :  { %1875 = vmatpush3.msk.msra.mxu0 %vm2499_vm3, %v2405_v18  ;;  %v250_v48 = vand.u32 4294901760, %v249_v40  ;;  %v256_v49 = vand.u32 4294901760, %v255_v41  ;;  %v267_v50 = vsub.f32 %v2563_v34, %v2593_v42  ;;  %v2620_v51 = vand.u32 4294901760, %v2595_v43  ;;  %v137_v41 = vld [vmem:[#allocation2] sm:$0xff]  ;;  %v3935_v58 = vld [vmem:[#allocation17_spill] sm:$0xff] }
  0x2c   :  { %1876 = vmatprep.subr.msk.mxu0 %vm2508_vm4, %v2405_v18  ;;  %vm2627_vm9 = vcmp.eq.s32.totalorder %v2474_v12, %v2465_v9  ;;  %vm2633_vm10 = vcmp.eq.s32.totalorder %v2477_v13, %v2465_v9  ;;  %v2637_v54 = vsub.f32 %v94_v47, %v94_v47  ;;  %v2640_v55 = vadd.s32 16, %v2439_v1 }
  0x2d   :  { %1877 = vmatpush3.msk.msra.mxu0 %vm2508_vm4, %v2405_v18  ;;  %1906 = vmatprep.subr.mxu1 %v250_v48  ;;  %v262_v56 = vand.u32 4294901760, %v261_v44  ;;  %v273_v57 = vsub.f32 %v2580_v38, %v2609_v46  ;;  %vm2649_vm11 = vcmp.eq.s32.totalorder %v2519_v23, %v2465_v9  ;;  %v93_v59 = vsel %vm2576_vm7, 1.0, %v3846_v20  ;;  %v138_v44 = vld [vmem:[#allocation2 + $0x8] sm:$0xff] }
  0x2e   :  { %3900 = vst [vmem:[#allocation24_spill] sm:$0xff] %v2640_v55  ;;  %1878 = vmatprep.subr.msk.mxu0 %vm2528_vm5, %v2405_v18  ;;  %1907 = vmatpush3.msra.mxu1 %v250_v48  ;;  %v279_v60 = vsub.f32 %v2595_v43, %v2620_v51  ;;  %v2662_v61 = vand.u32 4294901760, %v2637_v54  ;;  %v2664_v62 = vsub.f32 %v93_v59, %v93_v59  ;;  %v92_v63 = vsel %vm2604_vm8, 1.0, %v3846_v20 }
  0x2f   :  { %1879 = vmatpush3.msk.msra.mxu0 %vm2528_vm5, %v2405_v18  ;;  %1908 = vmatprep.subr.mxu1 %v256_v49  ;;  %v268_v0 = vand.u32 4294901760, %v267_v50  ;;  %v2672_v21 = vsub.f32 %v92_v63, %v92_v63  ;;  %v91_v22 = vsel %vm2627_vm9, 1.0, %v3846_v20  ;;  %v2678_v27 = vadd.s32 8, %v2439_v1 }
  0x30   :  { %1880 = vmatprep.subr.msk.mxu0 %vm2542_vm6, %v2405_v18  ;;  %1909 = vmatpush3.msra.mxu1 %v256_v49  ;;  %v285_v30 = vsub.f32 %v2637_v54, %v2662_v61  ;;  %v2686_v35 = vand.u32 4294901760, %v2664_v62  ;;  %vm2690_vm12 = vcmp.eq.s32.totalorder %v2552_v31, %v2465_v9  ;;  %v2694_v40 = vsub.f32 %v91_v22, %v91_v22 }
  0x31   :  { %3903 = vst [vmem:[#allocation25_spill] sm:$0xff] %v2678_v27  ;;  %1881 = vmatpush3.msk.msra.mxu0 %vm2542_vm6, %v2405_v18  ;;  %1910 = vmatprep.subr.mxu1 %v262_v56  ;;  %v274_v47 = vand.u32 4294901760, %v273_v57  ;;  %v2700_v48 = vand.u32 4294901760, %v2672_v21  ;;  %v90_v49 = vsel %vm2633_vm10, 1.0, %v3846_v20  ;;  %v89_v50 = vsel %vm2649_vm11, 1.0, %v3846_v20 }
  0x32   :  { %1882 = vmatprep.subr.msk.mxu0 %vm2576_vm7, %v2405_v18  ;;  %1911 = vmatpush3.msra.mxu1 %v262_v56  ;;  %v280_v59 = vand.u32 4294901760, %v279_v60  ;;  %v291_v57 = vsub.f32 %v2664_v62, %v2686_v35  ;;  %vm2715_vm13 = vcmp.eq.s32.totalorder %v2640_v55, %v2465_v9  ;;  %v2719_v22 = vsub.f32 %v90_v49, %v90_v49 }
  0x33   :  { %1883 = vmatpush3.msk.msra.mxu0 %vm2576_vm7, %v2405_v18  ;;  %1912 = vmatprep.subr.mxu1 %v268_v0  ;;  %v2725_v20 = vand.u32 4294901760, %v2694_v40  ;;  %v2727_v56 = vsub.f32 %v89_v50, %v89_v50  ;;  %v2729_v60 = vand.u32 4294901760, %v137_v41  ;;  %v2731_v31 = vand.u32 4294901760, %v138_v44 }
  0x34   :  { %1884 = vmatprep.subr.msk.mxu0 %vm2604_vm8, %v2405_v18  ;;  %1913 = vmatpush3.msra.mxu1 %v268_v0  ;;  %v286_v49 = vand.u32 4294901760, %v285_v30  ;;  %vm2738_vm14 = vcmp.eq.s32.totalorder %v2678_v27, %v2465_v9  ;;  %v3910_v23 = vmov 0.0   ;;  %v297_v13 = vsub.f32 %v2672_v21, %v2700_v48 }
  0x35   :  { %v88_v50 = vsel %vm2690_vm12, 1.0, %v3910_v23  ;;  %1885 = vmatpush3.msk.msra.mxu0 %vm2604_vm8, %v2405_v18  ;;  %1914 = vmatprep.subr.mxu1 %v274_v47  ;;  %v2751_v0 = vand.u32 4294901760, %v2719_v22  ;;  %v2754_v30 = vsub.f32 %v137_v41, %v2729_v60  ;;  %v2757_v27 = vsub.f32 %v138_v44, %v2731_v31 }
  0x36   :  { %1886 = vmatprep.subr.msk.mxu0 %vm2627_vm9, %v2405_v18  ;;  %1915 = vmatpush3.msra.mxu1 %v274_v47  ;;  %vm2764_vm15 = vcmp.eq.s32.totalorder %v2439_v1, %v2465_v9  ;;  %v2768_v11 = vsub.f32 %v88_v50, %v88_v50  ;;  %v87_v41 = vsel %vm2715_vm13, 1.0, %v3910_v23  ;;  %v292_v44 = vand.u32 4294901760, %v291_v57 }
  0x37   :  { %1887 = vmatpush3.msk.msra.mxu0 %vm2627_vm9, %v2405_v18  ;;  %1916 = vmatprep.subr.mxu1 %v280_v59  ;;  %v303_v47 = vsub.f32 %v2694_v40, %v2725_v20  ;;  %v2779_v9 = vand.u32 4294901760, %v2727_v56  ;;  %v2785_v1 = vsub.f32 %v87_v41, %v87_v41  ;;  %v86_v10 = vsel %vm2738_vm14, 1.0, %v3910_v23 }
  0x38   :  { %1888 = vmatprep.subr.msk.mxu0 %vm2633_vm10, %v2405_v18  ;;  %1917 = vmatpush3.msra.mxu1 %v280_v59  ;;  %v298_v57 = vand.u32 4294901760, %v297_v13  ;;  %v309_v8 = vsub.f32 %v2719_v22, %v2751_v0  ;;  %v85_v59 = vsel %vm2764_vm15, 1.0, %v3910_v23  ;;  %v2803_v41 = vand.u32 4294901760, %v2768_v11 }
  0x39   :  { %1889 = vmatpush3.msk.msra.mxu0 %vm2633_vm10, %v2405_v18  ;;  %1918 = vmatprep.subr.mxu1 %v286_v49  ;;  %v2805_v50 = vsub.f32 %v86_v10, %v86_v10  ;;  %v304_v13 = vand.u32 4294901760, %v303_v47  ;;  %v315_v7 = vsub.f32 %v2727_v56, %v2779_v9  ;;  %v2819_v10 = vand.u32 4294901760, %v2785_v1 }
  0x3a   :  { %1890 = vmatprep.subr.msk.mxu0 %vm2649_vm11, %v2405_v18  ;;  %1919 = vmatpush3.msra.mxu1 %v286_v49  ;;  %v3913_v49 = vand.u32 4294901760, %v2754_v30  ;;  %v2821_v5 = vsub.f32 %v85_v59, %v85_v59  ;;  %v310_v47 = vand.u32 4294901760, %v309_v8  ;;  %v3914_v4 = vand.u32 4294901760, %v2757_v27 }
  0x3b   :  { %1891 = vmatpush3.msk.msra.mxu0 %vm2649_vm11, %v2405_v18  ;;  %1920 = vmatprep.subr.mxu1 %v292_v44  ;;  %v2835_v59 = vand.u32 4294901760, %v2805_v50  ;;  %v316_v8 = vand.u32 4294901760, %v315_v7 }
  0x3c   :  { %1892 = vmatprep.subr.msk.mxu0 %vm2690_vm12, %v2405_v18  ;;  %1921 = vmatpush3.msra.mxu1 %v292_v44  ;;  %v209_v6 = vsub.f32 %v2754_v30, %v3913_v49  ;;  %v219_v23 = vsub.f32 %v2757_v27, %v3914_v4  ;;  %v321_v44 = vsub.f32 %v2768_v11, %v2803_v41  ;;  %v2846_v49 = vand.u32 4294901760, %v2821_v5 }
  0x3d   :  { %1893 = vmatpush3.msk.msra.mxu0 %vm2690_vm12, %v2405_v18  ;;  %1922 = vmatprep.subr.mxu1 %v298_v57 }
  0x3e   :  { %1894 = vmatprep.subr.msk.mxu0 %vm2715_vm13, %v2405_v18  ;;  %1923 = vmatpush3.msra.mxu1 %v298_v57  ;;  %v210_v4 = vand.u32 4294901760, %v209_v6  ;;  %v327_v57 = vsub.f32 %v2785_v1, %v2819_v10  ;;  %v220_v3 = vand.u32 4294901760, %v219_v23  ;;  %v322_v7 = vand.u32 4294901760, %v321_v44 }
  0x3f   :  { %1895 = vmatpush3.msk.msra.mxu0 %vm2715_vm13, %v2405_v18  ;;  %1924 = vmatprep.subr.mxu1 %v304_v13  ;;  %v333_v6 = vsub.f32 %v2805_v50, %v2835_v59  ;;  %v339_v23 = vsub.f32 %v2821_v5, %v2846_v49 }
  0x40   :  { %1896 = vmatprep.subr.msk.mxu0 %vm2738_vm14, %v2405_v18  ;;  %1925 = vmatpush3.msra.mxu1 %v304_v13  ;;  %v328_v13 = vand.u32 4294901760, %v327_v57 }
  0x41   :  { %1897 = vmatpush3.msk.msra.mxu0 %vm2738_vm14, %v2405_v18  ;;  %1926 = vmatprep.subr.mxu1 %v310_v47  ;;  %v340_v44 = vand.u32 4294901760, %v339_v23  ;;  %v3944_v23 = vld [vmem:[#allocation20_spill] sm:$0xff] }
  0x42   :  { %1898 = vmatprep.subr.msk.mxu0 %vm2764_vm15, %v2405_v18  ;;  %1927 = vmatpush3.msra.mxu1 %v310_v47  ;;  %v334_v47 = vand.u32 4294901760, %v333_v6 }
  0x43   :  { %1899 = vmatpush3.msk.msra.mxu0 %vm2764_vm15, %v2405_v18  ;;  %1928 = vmatprep.subr.mxu1 %v316_v8 }
  0x44   :  { %1900 = vmatprep.mubr.f32.mxu0 %v210_v4  ;;  %1929 = vmatpush3.msra.mxu1 %v316_v8  ;;  %v139_v8 = vld [vmem:[#allocation2 + $0x10] sm:$0xff]  ;;  %v3941_v4 = vld [vmem:[#allocation19_spill] sm:$0xff] }
  0x45   :  { %1944 = vmatprep.subr.mxu0 %v2524_v24  ;;  %1901 = vmatmul.mubr.f32.vlgmr.msra.gmra.mxu0 %v220_v3  ;;  %v140_v3 = vld [vmem:[#allocation2 + $0x18] sm:$0xff] }
  0x46   :  { %1930 = vmatprep.subr.mxu1 %v322_v7  ;;  %1945 = vmatpush3.msra.mxu0 %v2524_v24  ;;  %v2870_v24 = vand.u32 4294901760, %v139_v8 }
  0x47   :  { %1931 = vmatpush3.msra.mxu1 %v322_v7  ;;  %1946 = vmatprep.subr.mxu0 %v2532_v26 }
  0x48   :  { %1932 = vmatprep.subr.mxu1 %v328_v13  ;;  %1947 = vmatpush3.msra.mxu0 %v2532_v26  ;;  %v2874_v26 = vand.u32 4294901760, %v140_v3 }
  0x49   :  { %1933 = vmatpush3.msra.mxu1 %v328_v13  ;;  %1948 = vmatprep.subr.mxu0 %v2546_v29 }
  0x4a   :  { %1934 = vmatprep.subr.mxu1 %v334_v47  ;;  %1949 = vmatpush3.msra.mxu0 %v2546_v29  ;;  %v2889_v29 = vsub.f32 %v139_v8, %v2870_v24 }
  0x4b   :  { %1935 = vmatpush3.msra.mxu1 %v334_v47  ;;  %1950 = vmatprep.subr.mxu0 %v2563_v34 }
  0x4c   :  { %1936 = vmatprep.subr.mxu1 %v340_v44  ;;  %1951 = vmatpush3.msra.mxu0 %v2563_v34  ;;  %v2896_v34 = vsub.f32 %v140_v3, %v2874_v26 }
  0x4d   :  { %1937 = vmatpush3.msra.mxu1 %v340_v44  ;;  %1938 = vmatprep.mubr.f32.mxu1 %v2729_v60 }
  0x4e   :  { %1952 = vmatprep.subr.mxu0 %v2580_v38  ;;  %1939 = vmatmul.mubr.f32.vlgmr.msra.gmra.mxu1 %v2731_v31 }
  0x4f   :  { %1953 = vmatpush3.msra.mxu0 %v2580_v38  ;;  %1982 = vmatprep.subr.msk.mxu1 %vm2481_vm0, %v2405_v18  ;;  %v228_v38 = vand.u32 4294901760, %v2889_v29 }
  0x50   :  { %1954 = vmatprep.subr.mxu0 %v2595_v43  ;;  %1983 = vmatpush3.msk.msra.mxu1 %vm2481_vm0, %v2405_v18 }
  0x51   :  { %1955 = vmatpush3.msra.mxu0 %v2595_v43  ;;  %1984 = vmatprep.subr.msk.mxu1 %vm2487_vm1, %v2405_v18  ;;  %v238_v43 = vand.u32 4294901760, %v2896_v34 }
  0x52   :  { %1956 = vmatprep.subr.mxu0 %v2637_v54  ;;  %1985 = vmatpush3.msk.msra.mxu1 %vm2487_vm1, %v2405_v18 }
  0x53   :  { %1957 = vmatpush3.msra.mxu0 %v2637_v54  ;;  %1986 = vmatprep.subr.msk.mxu1 %vm2493_vm2, %v2405_v18  ;;  %v229_v54 = vsub.f32 %v2889_v29, %v228_v38 }
  0x54   :  { %1958 = vmatprep.subr.mxu0 %v2664_v62  ;;  %1987 = vmatpush3.msk.msra.mxu1 %vm2493_vm2, %v2405_v18 }
  0x55   :  { %1959 = vmatpush3.msra.mxu0 %v2664_v62  ;;  %1988 = vmatprep.subr.msk.mxu1 %vm2499_vm3, %v2405_v18  ;;  %v239_v62 = vsub.f32 %v2896_v34, %v238_v43 }
  0x56   :  { %1960 = vmatprep.subr.mxu0 %v2672_v21  ;;  %1989 = vmatpush3.msk.msra.mxu1 %vm2499_vm3, %v2405_v18 }
  0x57   :  { %1961 = vmatpush3.msra.mxu0 %v2672_v21  ;;  %1990 = vmatprep.subr.msk.mxu1 %vm2508_vm4, %v2405_v18  ;;  %v230_v21 = vand.u32 4294901760, %v229_v54 }
  0x58   :  { %1962 = vmatprep.subr.mxu0 %v2694_v40  ;;  %1991 = vmatpush3.msk.msra.mxu1 %vm2508_vm4, %v2405_v18 }
  0x59   :  { %1963 = vmatpush3.msra.mxu0 %v2694_v40  ;;  %1992 = vmatprep.subr.msk.mxu1 %vm2528_vm5, %v2405_v18  ;;  %v240_v40 = vand.u32 4294901760, %v239_v62  ;;  %v3950_v62 = vld [vmem:[#allocation22_spill] sm:$0xff] }
  0x5a   :  { %1964 = vmatprep.subr.mxu0 %v2719_v22  ;;  %1993 = vmatpush3.msk.msra.mxu1 %vm2528_vm5, %v2405_v18 }
  0x5b   :  { %1965 = vmatpush3.msra.mxu0 %v2719_v22  ;;  %1994 = vmatprep.subr.msk.mxu1 %vm2542_vm6, %v2405_v18 }
  0x5c   :  { %1966 = vmatprep.subr.mxu0 %v2727_v56  ;;  %1995 = vmatpush3.msk.msra.mxu1 %vm2542_vm6, %v2405_v18 }
  0x5d   :  { %1967 = vmatpush3.msra.mxu0 %v2727_v56  ;;  %1996 = vmatprep.subr.msk.mxu1 %vm2576_vm7, %v2405_v18 }
  0x5e   :  { %1968 = vmatprep.subr.mxu0 %v2768_v11  ;;  %1997 = vmatpush3.msk.msra.mxu1 %vm2576_vm7, %v2405_v18 }
  0x5f   :  { %1969 = vmatpush3.msra.mxu0 %v2768_v11  ;;  %1998 = vmatprep.subr.msk.mxu1 %vm2604_vm8, %v2405_v18  ;;  %v3079_v11 = vld [vmem:[%s3844_s3] ss:$0 sm:$0xff]  ;;  %s2407_s3 = smov [#allocation7]  }
  0x60   :  { %1970 = vmatprep.subr.mxu0 %v2785_v1  ;;  %1999 = vmatpush3.msk.msra.mxu1 %vm2604_vm8, %v2405_v18  ;;  %s1519_s28 = sshll.u32 %s2407_s3, 4  ;;  %s1520_s28 = int_to_ptr.vmem [resolvable:$true] %s1519_s28 }
  0x61   :  { %1903 = vmatprep.mubr.f32.mxu0 %v230_v21  ;;  %1971 = vmatpush3.msra.mxu0 %v2785_v1  ;;  %v3915_v1 = vand.u32 4294901760, %v2754_v30  ;;  %s2375_s29 = scalar_lea.vmem %s1520_s28, 16  ;;  %s2379_s30 = scalar_lea.vmem %s1520_s28, 32 }
  0x62   :  { %2000 = vmatprep.subr.msk.mxu1 %vm2627_vm9, %v2405_v18  ;;  %1904 = vmatmul.mubr.f32.gmra.mxu0 %v240_v40  ;;  %p2376_p10 = scmp.ne.s32.totalorder %s1520_s28, %s2375_s29  ;;  %p2380_p11 = scmp.lt.s32.totalorder %s1520_s28, %s1520_s28 }
  0x63   :  { %1972 = vmatprep.subr.mxu0 %v2805_v50  ;;  %2001 = vmatpush3.msk.msra.mxu1 %vm2627_vm9, %v2405_v18  ;;  %p2381_p12 = scmp.lt.s32.totalorder %s2379_s30, %s2375_s29 }
  0x64   :  { %1973 = vmatpush3.msra.mxu0 %v2805_v50  ;;  %2002 = vmatprep.subr.msk.mxu1 %vm2633_vm10, %v2405_v18 }
  0x65   :  { %1974 = vmatprep.subr.mxu0 %v2821_v5  ;;  %2003 = vmatpush3.msk.msra.mxu1 %vm2633_vm10, %v2405_v18  ;;  %p2382_p13 = por %p2381_p12, %p2380_p11 }
  0x66   :  { %1975 = vmatpush3.msra.mxu0 %v2821_v5  ;;  %1976 = vmatprep.mubr.f32.mxu0 %v2754_v30  ;;  %v3916_v5 = vand.u32 4294901760, %v2757_v27  ;;  %v3938_v30 = vld [vmem:[#allocation18_spill] sm:$0xff] }
  0x67   :  { %2004 = vmatprep.subr.msk.mxu1 %vm2649_vm11, %v2405_v18  ;;  %1977 = vmatmul.mubr.f32.vlgmr.msra.gmra.mxu0 %v2757_v27  ;;  %p2383_p0 = pnand %p2382_p13, %p2376_p10 }
  0x68   :  { %2005 = vmatpush3.msk.msra.mxu1 %vm2649_vm11, %v2405_v18  ;;  %2020 = vmatprep.subr.mxu0 %v2558_v32 }
  0x69   :  { %1941 = vmatprep.mubr.f32.mxu1 %v2870_v24  ;;  %2006 = vmatprep.subr.msk.mxu1 %vm2690_vm12, %v2405_v18 }
  0x6a   :  { %2021 = vmatpush3.msra.mxu0 %v2558_v32  ;;  %1942 = vmatmul.mubr.f32.gmra.mxu1 %v2874_v26  ;;  %v3926_v32 = vld [vmem:[#allocation14_spill] sm:$0xff] }
  0x6b   :  { %2007 = vmatpush3.msk.msra.mxu1 %vm2690_vm12, %v2405_v18  ;;  %2022 = vmatprep.subr.mxu0 %v2561_v33 }
  0x6c   :  { %1979 = vmatprep.mubr.f32.mxu0 %v2889_v29  ;;  %2008 = vmatprep.subr.msk.mxu1 %vm2715_vm13, %v2405_v18  ;;  %v3947_v29 = vld [vmem:[#allocation21_spill] sm:$0xff] }
  0x6d   :  { %2023 = vmatpush3.msra.mxu0 %v2561_v33  ;;  %2009 = vmatpush3.msk.msra.mxu1 %vm2715_vm13, %v2405_v18 }
  0x6e   :  { %1980 = vmatmul.mubr.f32.gmra.mxu0 %v2896_v34  ;;  %2024 = vmatprep.subr.mxu0 %v2572_v36 }
  0x6f   :  { %2010 = vmatprep.subr.msk.mxu1 %vm2738_vm14, %v2405_v18  ;;  %2025 = vmatpush3.msra.mxu0 %v2572_v36 }
  0x70   :  { %2011 = vmatpush3.msk.msra.mxu1 %vm2738_vm14, %v2405_v18  ;;  %2026 = vmatprep.subr.mxu0 %v2593_v42 }
  0x71   :  { %2012 = vmatprep.subr.msk.mxu1 %vm2764_vm15, %v2405_v18  ;;  %2027 = vmatpush3.msra.mxu0 %v2593_v42  ;;  %v3929_v42 = vld [vmem:[#allocation15_spill] sm:$0xff] }
  0x72   :  { %2013 = vmatpush3.msk.msra.mxu1 %vm2764_vm15, %v2405_v18  ;;  %2014 = vmatprep.mubr.f32.mxu1 %v3915_v1  ;;  %v815_v1 = vld [vmem:[#allocation5] sm:$0xff] }
  0x73   :  { %2028 = vmatprep.subr.mxu0 %v2609_v46  ;;  %2015 = vmatmul.mubr.f32.vlgmr.msra.gmra.mxu1 %v3916_v5 }
  0x74   :  { %2029 = vmatpush3.msra.mxu0 %v2609_v46  ;;  %2058 = vmatprep.subr.msk.mxu1 %vm2481_vm0, %v2405_v18 }
  0x75   :  { %2030 = vmatprep.subr.mxu0 %v2620_v51  ;;  %2059 = vmatpush3.msk.msra.mxu1 %vm2481_vm0, %v2405_v18  ;;  %vm3095_vm0 = vcmp.eq.s32.totalorder %v2442_v2, %v3079_v11  ;;  %v3922_v2 = vmov 0.0  }
  0x76   :  { %2031 = vmatpush3.msra.mxu0 %v2620_v51  ;;  %2060 = vmatprep.subr.msk.mxu1 %vm2487_vm1, %v2405_v18  ;;  %v136_v17 = vsel %vm3095_vm0, 1.0, %v3922_v2  ;;  %v3932_v51 = vld [vmem:[#allocation16_spill] sm:$0xff] }
  0x77   :  { %2017 = vmatprep.mubr.f32.mxu1 %v228_v38  ;;  %2032 = vmatprep.subr.mxu0 %v2662_v61  ;;  %v3141_v28 = vsub.f32 %v136_v17, %v136_v17  ;;  %v816_v17 = vld [vmem:[#allocation5 + $0x8] sm:$0xff] }
  0x78   :  { %2061 = vmatpush3.msk.msra.mxu1 %vm2487_vm1, %v2405_v18  ;;  %2033 = vmatpush3.msra.mxu0 %v2662_v61  ;;  %vm3109_vm1 = vcmp.eq.s32.totalorder %v3919_v15, %v3079_v11 }
  0x79   :  { %2018 = vmatmul.mubr.f32.gmra.mxu1 %v238_v43  ;;  %2062 = vmatprep.subr.msk.mxu1 %vm2493_vm2, %v2405_v18  ;;  %v135_v25 = vsel %vm3109_vm1, 1.0, %v3922_v2  ;;  %v3175_v46 = vand.u32 4294901760, %v3141_v28 }
  0x7a   :  { %2034 = vmatprep.subr.mxu0 %v2686_v35  ;;  %2063 = vmatpush3.msk.msra.mxu1 %vm2493_vm2, %v2405_v18  ;;  %vm3130_vm2 = vcmp.eq.s32.totalorder %v3923_v19, %v3079_v11  ;;  %v3157_v36 = vsub.f32 %v135_v25, %v135_v25 }
  0x7b   :  { %2035 = vmatpush3.msra.mxu0 %v2686_v35  ;;  %2064 = vmatprep.subr.msk.mxu1 %vm2499_vm3, %v2405_v18  ;;  %v134_v37 = vsel %vm3130_vm2, 1.0, %v3922_v2  ;;  %v927_v39 = vsub.f32 %v3141_v28, %v3175_v46 }
  0x7c   :  { %2036 = vmatprep.subr.mxu0 %v2700_v48  ;;  %2065 = vmatpush3.msk.msra.mxu1 %vm2499_vm3, %v2405_v18  ;;  %vm3149_vm3 = vcmp.eq.s32.totalorder %v3926_v32, %v3079_v11  ;;  %v3192_v61 = vsub.f32 %v134_v37, %v134_v37  ;;  %v3201_v27 = vand.u32 4294901760, %v3157_v36 }
  0x7d   :  { %2037 = vmatpush3.msra.mxu0 %v2700_v48  ;;  %2066 = vmatprep.subr.msk.mxu1 %vm2508_vm4, %v2405_v18  ;;  %v133_v53 = vsel %vm3149_vm3, 1.0, %v3922_v2 }
  0x7e   :  { %2038 = vmatprep.subr.mxu0 %v2725_v20  ;;  %2067 = vmatpush3.msk.msra.mxu1 %vm2508_vm4, %v2405_v18  ;;  %vm3166_vm4 = vcmp.eq.s32.totalorder %v3929_v42, %v3079_v11  ;;  %v3218_v22 = vsub.f32 %v133_v53, %v133_v53  ;;  %v933_v63 = vsub.f32 %v3157_v36, %v3201_v27  ;;  %v3377_v53 = vand.u32 4294901760, %v815_v1 }
  0x7f   :  { %2039 = vmatpush3.msra.mxu0 %v2725_v20  ;;  %2068 = vmatprep.subr.msk.mxu1 %vm2528_vm5, %v2405_v18  ;;  %v132_v48 = vsel %vm3166_vm4, 1.0, %v3922_v2 }
  0x80   :  { %2040 = vmatprep.subr.mxu0 %v2751_v0  ;;  %2069 = vmatpush3.msk.msra.mxu1 %vm2528_vm5, %v2405_v18  ;;  %vm3179_vm5 = vcmp.eq.s32.totalorder %v3932_v51, %v3079_v11  ;;  %v3244_v50 = vsub.f32 %v132_v48, %v132_v48  ;;  %v934_v44 = vand.u32 4294901760, %v933_v63 }
  0x81   :  { %2041 = vmatpush3.msra.mxu0 %v2751_v0  ;;  %2070 = vmatprep.subr.msk.mxu1 %vm2542_vm6, %v2405_v18  ;;  %v131_v56 = vsel %vm3179_vm5, 1.0, %v3922_v2  ;;  %v3236_v0 = vand.u32 4294901760, %v3192_v61 }
  0x82   :  { %2042 = vmatprep.subr.mxu0 %v2779_v9  ;;  %2071 = vmatpush3.msk.msra.mxu1 %vm2542_vm6, %v2405_v18  ;;  %vm3205_vm6 = vcmp.eq.s32.totalorder %v3935_v58, %v3079_v11  ;;  %v3292_v13 = vand.u32 4294901760, %v3244_v50 }
  0x83   :  { %2043 = vmatpush3.msra.mxu0 %v2779_v9  ;;  %2072 = vmatprep.subr.msk.mxu1 %vm2576_vm7, %v2405_v18  ;;  %v939_v55 = vsub.f32 %v3192_v61, %v3236_v0 }
  0x84   :  { %2044 = vmatprep.subr.mxu0 %v2803_v41  ;;  %2073 = vmatpush3.msk.msra.mxu1 %vm2576_vm7, %v2405_v18  ;;  %vm3240_vm7 = vcmp.eq.s32.totalorder %v3938_v30, %v3079_v11  ;;  %v951_v54 = vsub.f32 %v3244_v50, %v3292_v13 }
  0x85   :  { %2045 = vmatpush3.msra.mxu0 %v2803_v41  ;;  %2074 = vmatprep.subr.msk.mxu1 %vm2604_vm8, %v2405_v18  ;;  %v130_v41 = vsel %vm3205_vm6, 1.0, %v3922_v2  ;;  %v129_v6 = vsel %vm3240_vm7, 1.0, %v3922_v2  ;;  %v940_v43 = vand.u32 4294901760, %v939_v55 }
  0x86   :  { %2046 = vmatprep.subr.mxu0 %v2819_v10  ;;  %2075 = vmatpush3.msk.msra.mxu1 %vm2604_vm8, %v2405_v18  ;;  %vm3268_vm8 = vcmp.eq.s32.totalorder %v3941_v4, %v3079_v11  ;;  %v3278_v7 = vsub.f32 %v130_v41, %v130_v41  ;;  %v3322_v34 = vsub.f32 %v129_v6, %v129_v6  ;;  %v952_v58 = vand.u32 4294901760, %v951_v54  ;;  %v3956_v41 = vld [vmem:[#allocation24_spill] sm:$0xff]  ;;  %v3962_v54 = vld [vmem:[#allocation11_spill] sm:$0xff] }
  0x87   :  { %2047 = vmatpush3.msra.mxu0 %v2819_v10  ;;  %2076 = vmatprep.subr.msk.mxu1 %vm2627_vm9, %v2405_v18  ;;  %v3255_v10 = vsub.f32 %v131_v56, %v131_v56  ;;  %v128_v3 = vsel %vm3268_vm8, 1.0, %v3922_v2 }
  0x88   :  { %2048 = vmatprep.subr.mxu0 %v2835_v59  ;;  %2077 = vmatpush3.msk.msra.mxu1 %vm2627_vm9, %v2405_v18  ;;  %vm3296_vm9 = vcmp.eq.s32.totalorder %v3944_v23, %v3079_v11  ;;  %v3328_v38 = vand.u32 4294901760, %v3278_v7  ;;  %v3344_v40 = vsub.f32 %v128_v3, %v128_v3  ;;  %v3359_v25 = vand.u32 4294901760, %v3322_v34  ;;  %v3959_v23 = vld [vmem:[#allocation25_spill] sm:$0xff] }
  0x89   :  { %2049 = vmatpush3.msra.mxu0 %v2835_v59  ;;  %2078 = vmatprep.subr.msk.mxu1 %vm2633_vm10, %v2405_v18  ;;  %v3264_v59 = vand.u32 4294901760, %v3218_v22  ;;  %v3305_v8 = vand.u32 4294901760, %v3255_v10  ;;  %v3419_v3 = vsub.f32 %v815_v1, %v3377_v53 }
  0x8a   :  { %2050 = vmatprep.subr.mxu0 %v2846_v49  ;;  %2079 = vmatpush3.msk.msra.mxu1 %vm2633_vm10, %v2405_v18  ;;  %vm3318_vm10 = vcmp.eq.s32.totalorder %v3947_v29, %v3079_v11  ;;  %v963_v37 = vsub.f32 %v3278_v7, %v3328_v38  ;;  %v3381_v48 = vand.u32 4294901760, %v3344_v40 }
  0x8b   :  { %2051 = vmatpush3.msra.mxu0 %v2846_v49  ;;  %2052 = vmatprep.mubr.f32.mxu0 %v2729_v60  ;;  %v928_v49 = vand.u32 4294901760, %v927_v39  ;;  %v945_v12 = vsub.f32 %v3218_v22, %v3264_v59  ;;  %v957_v5 = vsub.f32 %v3255_v10, %v3305_v8  ;;  %v126_v15 = vsel %vm3318_vm10, 1.0, %v3922_v2 }
  0x8c   :  { %2080 = vmatprep.subr.msk.mxu1 %vm2649_vm11, %v2405_v18  ;;  %2053 = vmatmul.mubr.f32.vlgmr.msra.gmra.mxu0 %v2731_v31  ;;  %v3383_v56 = vsub.f32 %v126_v15, %v126_v15  ;;  %v3385_v39 = vand.u32 4294901760, %v816_v17  ;;  %v964_v55 = vand.u32 4294901760, %v963_v37 }
  0x8d   :  { %2081 = vmatpush3.msk.msra.mxu1 %vm2649_vm11, %v2405_v18  ;;  %2096 = vmatprep.subr.msk.mxu0 %vm3095_vm0, %v2405_v18  ;;  %vm3340_vm11 = vcmp.eq.s32.totalorder %v3950_v62, %v3079_v11  ;;  %v946_v19 = vand.u32 4294901760, %v945_v12  ;;  %v958_v30 = vand.u32 4294901760, %v957_v5  ;;  %v975_v12 = vsub.f32 %v3344_v40, %v3381_v48 }
  0x8e   :  { %2082 = vmatprep.subr.msk.mxu1 %vm2690_vm12, %v2405_v18  ;;  %2097 = vmatpush3.msk.msra.mxu0 %vm3095_vm0, %v2405_v18  ;;  %v125_v51 = vsel %vm3340_vm11, 1.0, %v3922_v2  ;;  %v3427_v29 = vand.u32 4294901760, %v3383_v56 }
  0x8f   :  { %2083 = vmatpush3.msk.msra.mxu1 %vm2690_vm12, %v2405_v18  ;;  %2098 = vmatprep.subr.msk.mxu0 %vm3109_vm1, %v2405_v18 }
  0x90   :  { %2055 = vmatprep.mubr.f32.mxu0 %v2870_v24  ;;  %2084 = vmatprep.subr.msk.mxu1 %vm2715_vm13, %v2405_v18 }
  0x91   :  { %2099 = vmatpush3.msk.msra.mxu0 %vm3109_vm1, %v2405_v18  ;;  %2085 = vmatpush3.msk.msra.mxu1 %vm2715_vm13, %v2405_v18  ;;  %vm3392_vm13 = vcmp.eq.s32.totalorder %v3956_v41, %v3079_v11 }
  0x92   :  { %2056 = vmatmul.mubr.f32.gmra.mxu0 %v2874_v26  ;;  %2100 = vmatprep.subr.msk.mxu0 %vm3130_vm2, %v2405_v18 }
  0x93   :  { %2086 = vmatprep.subr.msk.mxu1 %vm2738_vm14, %v2405_v18  ;;  %2101 = vmatpush3.msk.msra.mxu0 %vm3130_vm2, %v2405_v18 }
  0x94   :  { %2087 = vmatpush3.msk.msra.mxu1 %vm2738_vm14, %v2405_v18  ;;  %2102 = vmatprep.subr.msk.mxu0 %vm3149_vm3, %v2405_v18  ;;  %vm3414_vm14 = vcmp.eq.s32.totalorder %v3959_v23, %v3079_v11 }
  0x95   :  { %2088 = vmatprep.subr.msk.mxu1 %vm2764_vm15, %v2405_v18  ;;  %2103 = vmatpush3.msk.msra.mxu0 %vm3149_vm3, %v2405_v18 }
  0x96   :  { %2089 = vmatpush3.msk.msra.mxu1 %vm2764_vm15, %v2405_v18  ;;  %2090 = vmatprep.mubr.f32.mxu1 %v2729_v60  ;;  %vm3440_vm15 = vcmp.eq.s32.totalorder %v3962_v54, %v3079_v11 }
  0x97   :  { %2104 = vmatprep.subr.msk.mxu0 %vm3166_vm4, %v2405_v18  ;;  %2091 = vmatmul.mubr.f32.vlgmr.msra.gmra.mxu1 %v2731_v31  ;;  %v127_v31 = vsel %vm3296_vm9, 1.0, %v3922_v2  ;;  %v121_v41 = vsel %vm3440_vm15, 1.0, %v3922_v2 }
  0x98   :  { %2105 = vmatpush3.msk.msra.mxu0 %vm3166_vm4, %v2405_v18  ;;  %2134 = vmatprep.subr.mxu1 %v928_v49  ;;  %v3361_v32 = vsub.f32 %v127_v31, %v127_v31  ;;  %v3430_v31 = vsub.f32 %v816_v17, %v3385_v39 }
  0x99   :  { %2106 = vmatprep.subr.msk.mxu0 %vm3179_vm5, %v2405_v18  ;;  %2135 = vmatpush3.msra.mxu1 %v928_v49  ;;  %v3404_v49 = vsub.f32 %v125_v51, %v125_v51  ;;  %v987_v51 = vsub.f32 %v3383_v56, %v3427_v29 }
  0x9a   :  { %2107 = vmatpush3.msk.msra.mxu0 %vm3179_vm5, %v2405_v18  ;;  %2136 = vmatprep.subr.mxu1 %v934_v44  ;;  %v3402_v4 = vand.u32 4294901760, %v3361_v32 }
  0x9b   :  { %2093 = vmatprep.mubr.f32.mxu1 %v2870_v24  ;;  %2108 = vmatprep.subr.msk.mxu0 %vm3205_vm6, %v2405_v18  ;;  %v3953_v24 = vld [vmem:[#allocation23_spill] sm:$0xff]  ;;  %v3452_v17 = vand.u32 4294901760, %v3404_v49 }
  0x9c   :  { %2137 = vmatpush3.msra.mxu1 %v934_v44  ;;  %2109 = vmatpush3.msk.msra.mxu0 %vm3205_vm6, %v2405_v18  ;;  %vm3370_vm12 = vcmp.eq.s32.totalorder %v3953_v24, %v3079_v11  ;;  %v981_v15 = vsub.f32 %v3361_v32, %v3402_v4  ;;  %v122_v11 = vsel %vm3414_vm14, 1.0, %v3922_v2  ;;  %v976_v24 = vand.u32 4294901760, %v975_v12 }
  0x9d   :  { %2094 = vmatmul.mubr.f32.gmra.mxu1 %v2874_v26  ;;  %2138 = vmatprep.subr.mxu1 %v940_v43  ;;  %v969_v26 = vsub.f32 %v3322_v34, %v3359_v25  ;;  %v124_v6 = vsel %vm3370_vm12, 1.0, %v3922_v2  ;;  %v993_v23 = vsub.f32 %v3404_v49, %v3452_v17  ;;  %v3494_v12 = vsub.f32 %v121_v41, %v121_v41 }
  0x9e   :  { %2110 = vmatprep.subr.msk.mxu0 %vm3240_vm7, %v2405_v18  ;;  %2139 = vmatpush3.msra.mxu1 %v940_v43  ;;  %v123_v43 = vsel %vm3392_vm13, 1.0, %v3922_v2  ;;  %v3444_v1 = vsub.f32 %v124_v6, %v124_v6  ;;  %v982_v6 = vand.u32 4294901760, %v981_v15 }
  0x9f   :  { %2111 = vmatpush3.msk.msra.mxu0 %vm3240_vm7, %v2405_v18  ;;  %2140 = vmatprep.subr.mxu1 %v946_v19  ;;  %v970_v5 = vand.u32 4294901760, %v969_v26  ;;  %v3461_v37 = vsub.f32 %v123_v43, %v123_v43  ;;  %v3478_v26 = vsub.f32 %v122_v11, %v122_v11  ;;  %v988_v43 = vand.u32 4294901760, %v987_v51 }
  0xa0   :  { %2112 = vmatprep.subr.msk.mxu0 %vm3268_vm8, %v2405_v18  ;;  %2141 = vmatpush3.msra.mxu1 %v946_v19  ;;  %v886_v19 = vand.u32 4294901760, %v3419_v3  ;;  %v994_v11 = vand.u32 4294901760, %v993_v23  ;;  %v3519_v41 = vand.u32 4294901760, %v3494_v12 }
  0xa1   :  { %2113 = vmatpush3.msk.msra.mxu0 %vm3268_vm8, %v2405_v18  ;;  %2142 = vmatprep.subr.mxu1 %v952_v58  ;;  %v3508_v15 = vand.u32 4294901760, %v3478_v26 }
  0xa2   :  { %2114 = vmatprep.subr.msk.mxu0 %vm3296_vm9, %v2405_v18  ;;  %2143 = vmatpush3.msra.mxu1 %v952_v58  ;;  %v3864_v58 = vand.u32 4294901760, %v3430_v31  ;;  %v887_v2 = vsub.f32 %v3419_v3, %v886_v19 }
  0xa3   :  { %2115 = vmatpush3.msk.msra.mxu0 %vm3296_vm9, %v2405_v18  ;;  %2144 = vmatprep.subr.mxu1 %v958_v30 }
  0xa4   :  { %2116 = vmatprep.subr.msk.mxu0 %vm3318_vm10, %v2405_v18  ;;  %2145 = vmatpush3.msra.mxu1 %v958_v30  ;;  %v3476_v30 = vand.u32 4294901760, %v3444_v1  ;;  %v897_v54 = vsub.f32 %v3430_v31, %v3864_v58  ;;  %v888_v51 = vand.u32 4294901760, %v887_v2 }
  0xa5   :  { %2117 = vmatpush3.msk.msra.mxu0 %vm3318_vm10, %v2405_v18  ;;  %2146 = vmatprep.subr.mxu1 %v964_v55 }
  0xa6   :  { %2118 = vmatprep.subr.msk.mxu0 %vm3340_vm11, %v2405_v18  ;;  %2147 = vmatpush3.msra.mxu1 %v964_v55  ;;  %v3492_v55 = vand.u32 4294901760, %v3461_v37  ;;  %v898_v58 = vand.u32 4294901760, %v897_v54  ;;  %v1017_v54 = vsub.f32 %v3494_v12, %v3519_v41 }
  0xa7   :  { %2119 = vmatpush3.msk.msra.mxu0 %vm3340_vm11, %v2405_v18  ;;  %2148 = vmatprep.subr.mxu1 %v970_v5 }
  0xa8   :  { %2120 = vmatprep.subr.msk.mxu0 %vm3370_vm12, %v2405_v18  ;;  %2149 = vmatpush3.msra.mxu1 %v970_v5  ;;  %v999_v5 = vsub.f32 %v3444_v1, %v3476_v30 }
  0xa9   :  { %2121 = vmatpush3.msk.msra.mxu0 %vm3370_vm12, %v2405_v18  ;;  %2150 = vmatprep.subr.mxu1 %v976_v24 }
  0xaa   :  { %2122 = vmatprep.subr.msk.mxu0 %vm3392_vm13, %v2405_v18  ;;  %2151 = vmatpush3.msra.mxu1 %v976_v24  ;;  %v1005_v24 = vsub.f32 %v3461_v37, %v3492_v55  ;;  %v1000_v23 = vand.u32 4294901760, %v999_v5  ;;  %v1018_v5 = vand.u32 4294901760, %v1017_v54 }
  0xab   :  { %2123 = vmatpush3.msk.msra.mxu0 %vm3392_vm13, %v2405_v18  ;;  %2152 = vmatprep.subr.mxu1 %v982_v6 }
  0xac   :  { %2124 = vmatprep.subr.msk.mxu0 %vm3414_vm14, %v2405_v18  ;;  %2153 = vmatpush3.msra.mxu1 %v982_v6  ;;  %v1011_v6 = vsub.f32 %v3478_v26, %v3508_v15  ;;  %v1006_v2 = vand.u32 4294901760, %v1005_v24 }
  0xad   :  { %2125 = vmatpush3.msk.msra.mxu0 %vm3414_vm14, %v2405_v18  ;;  %2154 = vmatprep.subr.mxu1 %v988_v43 }
  0xae   :  { %2126 = vmatprep.subr.msk.mxu0 %vm3440_vm15, %v2405_v18  ;;  %2155 = vmatpush3.msra.mxu1 %v988_v43  ;;  %v1012_v43 = vand.u32 4294901760, %v1011_v6 }
  0xaf   :  { %2127 = vmatpush3.msk.msra.mxu0 %vm3440_vm15, %v2405_v18  ;;  %2156 = vmatprep.subr.mxu1 %v994_v11 }
  0xb0   :  { %2128 = vmatprep.mubr.f32.mxu0 %v888_v51  ;;  %2157 = vmatpush3.msra.mxu1 %v994_v11  ;;  %v817_v11 = vld [vmem:[#allocation5 + $0x10] sm:$0xff] }
  0xb1   :  { %2172 = vmatprep.subr.mxu0 %v3141_v28  ;;  %2129 = vmatmul.mubr.f32.vlgmr.msra.gmra.mxu0 %v898_v58  ;;  %v818_v58 = vld [vmem:[#allocation5 + $0x18] sm:$0xff] }
  0xb2   :  { %2158 = vmatprep.subr.mxu1 %v1000_v23  ;;  %2173 = vmatpush3.msra.mxu0 %v3141_v28  ;;  %v3543_v28 = vand.u32 4294901760, %v817_v11 }
  0xb3   :  { %2159 = vmatpush3.msra.mxu1 %v1000_v23  ;;  %2174 = vmatprep.subr.mxu0 %v3157_v36 }
  0xb4   :  { %2160 = vmatprep.subr.mxu1 %v1006_v2  ;;  %2175 = vmatpush3.msra.mxu0 %v3157_v36  ;;  %v3547_v36 = vand.u32 4294901760, %v818_v58 }
  0xb5   :  { %2161 = vmatpush3.msra.mxu1 %v1006_v2  ;;  %2176 = vmatprep.subr.mxu0 %v3192_v61 }
  0xb6   :  { %2162 = vmatprep.subr.mxu1 %v1012_v43  ;;  %2177 = vmatpush3.msra.mxu0 %v3192_v61  ;;  %v3562_v61 = vsub.f32 %v817_v11, %v3543_v28 }
  0xb7   :  { %2163 = vmatpush3.msra.mxu1 %v1012_v43  ;;  %2178 = vmatprep.subr.mxu0 %v3218_v22 }
  0xb8   :  { %2164 = vmatprep.subr.mxu1 %v1018_v5  ;;  %2179 = vmatpush3.msra.mxu0 %v3218_v22  ;;  %v3569_v22 = vsub.f32 %v818_v58, %v3547_v36 }
  0xb9   :  { %2165 = vmatpush3.msra.mxu1 %v1018_v5  ;;  %2166 = vmatprep.mubr.f32.mxu1 %v3377_v53 }
  0xba   :  { %2180 = vmatprep.subr.mxu0 %v3244_v50  ;;  %2167 = vmatmul.mubr.f32.vlgmr.msra.gmra.mxu1 %v3385_v39 }
  0xbb   :  { %2181 = vmatpush3.msra.mxu0 %v3244_v50  ;;  %2210 = vmatprep.subr.msk.mxu1 %vm3095_vm0, %v2405_v18  ;;  %v906_v50 = vand.u32 4294901760, %v3562_v61 }
  0xbc   :  { %2182 = vmatprep.subr.mxu0 %v3255_v10  ;;  %2211 = vmatpush3.msk.msra.mxu1 %vm3095_vm0, %v2405_v18 }
  0xbd   :  { %2183 = vmatpush3.msra.mxu0 %v3255_v10  ;;  %2212 = vmatprep.subr.msk.mxu1 %vm3109_vm1, %v2405_v18  ;;  %v916_v10 = vand.u32 4294901760, %v3569_v22 }
  0xbe   :  { %2184 = vmatprep.subr.mxu0 %v3278_v7  ;;  %2213 = vmatpush3.msk.msra.mxu1 %vm3109_vm1, %v2405_v18 }
  0xbf   :  { %2185 = vmatpush3.msra.mxu0 %v3278_v7  ;;  %2214 = vmatprep.subr.msk.mxu1 %vm3130_vm2, %v2405_v18  ;;  %v907_v7 = vsub.f32 %v3562_v61, %v906_v50 }
  0xc0   :  { %2186 = vmatprep.subr.mxu0 %v3322_v34  ;;  %2215 = vmatpush3.msk.msra.mxu1 %vm3130_vm2, %v2405_v18 }
  0xc1   :  { %2187 = vmatpush3.msra.mxu0 %v3322_v34  ;;  %2216 = vmatprep.subr.msk.mxu1 %vm3149_vm3, %v2405_v18  ;;  %v917_v34 = vsub.f32 %v3569_v22, %v916_v10 }
  0xc2   :  { %2188 = vmatprep.subr.mxu0 %v3344_v40  ;;  %2217 = vmatpush3.msk.msra.mxu1 %vm3149_vm3, %v2405_v18 }
  0xc3   :  { %2189 = vmatpush3.msra.mxu0 %v3344_v40  ;;  %2218 = vmatprep.subr.msk.mxu1 %vm3166_vm4, %v2405_v18  ;;  %v908_v40 = vand.u32 4294901760, %v907_v7 }
  0xc4   :  { %2190 = vmatprep.subr.mxu0 %v3361_v32  ;;  %2219 = vmatpush3.msk.msra.mxu1 %vm3166_vm4, %v2405_v18 }
  0xc5   :  { %2191 = vmatpush3.msra.mxu0 %v3361_v32  ;;  %2220 = vmatprep.subr.msk.mxu1 %vm3179_vm5, %v2405_v18  ;;  %v918_v32 = vand.u32 4294901760, %v917_v34 }
  0xc6   :  { %2192 = vmatprep.subr.mxu0 %v3383_v56  ;;  %2221 = vmatpush3.msk.msra.mxu1 %vm3179_vm5, %v2405_v18 }
  0xc7   :  { %2193 = vmatpush3.msra.mxu0 %v3383_v56  ;;  %2222 = vmatprep.subr.msk.mxu1 %vm3205_vm6, %v2405_v18 }
  0xc8   :  { %2194 = vmatprep.subr.mxu0 %v3404_v49  ;;  %2223 = vmatpush3.msk.msra.mxu1 %vm3205_vm6, %v2405_v18 }
  0xc9   :  { %2195 = vmatpush3.msra.mxu0 %v3404_v49  ;;  %2224 = vmatprep.subr.msk.mxu1 %vm3240_vm7, %v2405_v18 }
  0xca   :  { %2196 = vmatprep.subr.mxu0 %v3444_v1  ;;  %2225 = vmatpush3.msk.msra.mxu1 %vm3240_vm7, %v2405_v18 }
  0xcb   :  { %2197 = vmatpush3.msra.mxu0 %v3444_v1  ;;  %2226 = vmatprep.subr.msk.mxu1 %vm3268_vm8, %v2405_v18 }
  0xcc   :  { %2198 = vmatprep.subr.mxu0 %v3461_v37  ;;  %2227 = vmatpush3.msk.msra.mxu1 %vm3268_vm8, %v2405_v18 }
  0xcd   :  { %2131 = vmatprep.mubr.f32.mxu0 %v908_v40  ;;  %2199 = vmatpush3.msra.mxu0 %v3461_v37 }
  0xce   :  { %2228 = vmatprep.subr.msk.mxu1 %vm3296_vm9, %v2405_v18  ;;  %2132 = vmatmul.mubr.f32.gmra.mxu0 %v918_v32 }
  0xcf   :  { %2200 = vmatprep.subr.mxu0 %v3478_v26  ;;  %2229 = vmatpush3.msk.msra.mxu1 %vm3296_vm9, %v2405_v18 }
  0xd0   :  { %2201 = vmatpush3.msra.mxu0 %v3478_v26  ;;  %2230 = vmatprep.subr.msk.mxu1 %vm3318_vm10, %v2405_v18 }
  0xd1   :  { %2202 = vmatprep.subr.mxu0 %v3494_v12  ;;  %2231 = vmatpush3.msk.msra.mxu1 %vm3318_vm10, %v2405_v18 }
  0xd2   :  { %2203 = vmatpush3.msra.mxu0 %v3494_v12  ;;  %2204 = vmatprep.mubr.f32.mxu0 %v3419_v3 }
  0xd3   :  { %2232 = vmatprep.subr.msk.mxu1 %vm3340_vm11, %v2405_v18  ;;  %2205 = vmatmul.mubr.f32.vlgmr.msra.gmra.mxu0 %v3430_v31 }
  0xd4   :  { %2233 = vmatpush3.msk.msra.mxu1 %vm3340_vm11, %v2405_v18  ;;  %2248 = vmatprep.subr.mxu0 %v3175_v46 }
  0xd5   :  { %2169 = vmatprep.mubr.f32.mxu1 %v3543_v28  ;;  %2234 = vmatprep.subr.msk.mxu1 %vm3370_vm12, %v2405_v18 }
  0xd6   :  { %2249 = vmatpush3.msra.mxu0 %v3175_v46  ;;  %2170 = vmatmul.mubr.f32.gmra.mxu1 %v3547_v36  ;;  %v3965_v46 = vand.u32 4294901760, %v3430_v31 }
  0xd7   :  { %2235 = vmatpush3.msk.msra.mxu1 %vm3370_vm12, %v2405_v18  ;;  %2250 = vmatprep.subr.mxu0 %v3201_v27 }
  0xd8   :  { %2207 = vmatprep.mubr.f32.mxu0 %v3562_v61  ;;  %2236 = vmatprep.subr.msk.mxu1 %vm3392_vm13, %v2405_v18 }
  0xd9   :  { %2251 = vmatpush3.msra.mxu0 %v3201_v27  ;;  %2237 = vmatpush3.msk.msra.mxu1 %vm3392_vm13, %v2405_v18 }
  0xda   :  { %2208 = vmatmul.mubr.f32.gmra.mxu0 %v3569_v22  ;;  %2252 = vmatprep.subr.mxu0 %v3236_v0 }
  0xdb   :  { %2238 = vmatprep.subr.msk.mxu1 %vm3414_vm14, %v2405_v18  ;;  %2253 = vmatpush3.msra.mxu0 %v3236_v0 }
  0xdc   :  { %2239 = vmatpush3.msk.msra.mxu1 %vm3414_vm14, %v2405_v18  ;;  %2254 = vmatprep.subr.mxu0 %v3264_v59 }
  0xdd   :  { %2240 = vmatprep.subr.msk.mxu1 %vm3440_vm15, %v2405_v18  ;;  %2255 = vmatpush3.msra.mxu0 %v3264_v59 }
  0xde   :  { %2241 = vmatpush3.msk.msra.mxu1 %vm3440_vm15, %v2405_v18  ;;  %2242 = vmatprep.mubr.f32.mxu1 %v886_v19 }
  0xdf   :  { %2256 = vmatprep.subr.mxu0 %v3292_v13  ;;  %2243 = vmatmul.mubr.f32.vlgmr.msra.gmra.mxu1 %v3965_v46 }
  0xe0   :  { %2257 = vmatpush3.msra.mxu0 %v3292_v13  ;;  %2286 = vmatprep.subr.msk.mxu1 %vm3095_vm0, %v2405_v18 }
  0xe1   :  { %2258 = vmatprep.subr.mxu0 %v3305_v8  ;;  %2287 = vmatpush3.msk.msra.mxu1 %vm3095_vm0, %v2405_v18 }
  0xe2   :  { %2259 = vmatpush3.msra.mxu0 %v3305_v8  ;;  %2288 = vmatprep.subr.msk.mxu1 %vm3109_vm1, %v2405_v18 }
  0xe3   :  { %2245 = vmatprep.mubr.f32.mxu1 %v906_v50  ;;  %2260 = vmatprep.subr.mxu0 %v3328_v38 }
  0xe4   :  { %2289 = vmatpush3.msk.msra.mxu1 %vm3109_vm1, %v2405_v18  ;;  %2261 = vmatpush3.msra.mxu0 %v3328_v38 }
  0xe5   :  { %2246 = vmatmul.mubr.f32.gmra.mxu1 %v916_v10  ;;  %2290 = vmatprep.subr.msk.mxu1 %vm3130_vm2, %v2405_v18 }
  0xe6   :  { %2262 = vmatprep.subr.mxu0 %v3359_v25  ;;  %2291 = vmatpush3.msk.msra.mxu1 %vm3130_vm2, %v2405_v18 }
  0xe7   :  { %2263 = vmatpush3.msra.mxu0 %v3359_v25  ;;  %2292 = vmatprep.subr.msk.mxu1 %vm3149_vm3, %v2405_v18 }
  0xe8   :  { %2264 = vmatprep.subr.mxu0 %v3381_v48  ;;  %2293 = vmatpush3.msk.msra.mxu1 %vm3149_vm3, %v2405_v18 }
  0xe9   :  { %2265 = vmatpush3.msra.mxu0 %v3381_v48  ;;  %2294 = vmatprep.subr.msk.mxu1 %vm3166_vm4, %v2405_v18 }
  0xea   :  { %2266 = vmatprep.subr.mxu0 %v3402_v4  ;;  %2295 = vmatpush3.msk.msra.mxu1 %vm3166_vm4, %v2405_v18 }
  0xeb   :  { %2267 = vmatpush3.msra.mxu0 %v3402_v4  ;;  %2296 = vmatprep.subr.msk.mxu1 %vm3179_vm5, %v2405_v18 }
  0xec   :  { %2268 = vmatprep.subr.mxu0 %v3427_v29  ;;  %2297 = vmatpush3.msk.msra.mxu1 %vm3179_vm5, %v2405_v18 }
  0xed   :  { %2269 = vmatpush3.msra.mxu0 %v3427_v29  ;;  %2298 = vmatprep.subr.msk.mxu1 %vm3205_vm6, %v2405_v18 }
  0xee   :  { %2270 = vmatprep.subr.mxu0 %v3452_v17  ;;  %2299 = vmatpush3.msk.msra.mxu1 %vm3205_vm6, %v2405_v18 }
  0xef   :  { %2271 = vmatpush3.msra.mxu0 %v3452_v17  ;;  %2300 = vmatprep.subr.msk.mxu1 %vm3240_vm7, %v2405_v18 }
  0xf0   :  { %2272 = vmatprep.subr.mxu0 %v3476_v30  ;;  %2301 = vmatpush3.msk.msra.mxu1 %vm3240_vm7, %v2405_v18 }
  0xf1   :  { %2273 = vmatpush3.msra.mxu0 %v3476_v30  ;;  %2302 = vmatprep.subr.msk.mxu1 %vm3268_vm8, %v2405_v18 }
  0xf2   :  { %2274 = vmatprep.subr.mxu0 %v3492_v55  ;;  %2303 = vmatpush3.msk.msra.mxu1 %vm3268_vm8, %v2405_v18 }
  0xf3   :  { %2275 = vmatpush3.msra.mxu0 %v3492_v55  ;;  %2304 = vmatprep.subr.msk.mxu1 %vm3296_vm9, %v2405_v18 }
  0xf4   :  { %2276 = vmatprep.subr.mxu0 %v3508_v15  ;;  %2305 = vmatpush3.msk.msra.mxu1 %vm3296_vm9, %v2405_v18 }
  0xf5   :  { %2277 = vmatpush3.msra.mxu0 %v3508_v15  ;;  %2306 = vmatprep.subr.msk.mxu1 %vm3318_vm10, %v2405_v18 }
  0xf6   :  { %2278 = vmatprep.subr.mxu0 %v3519_v41  ;;  %2307 = vmatpush3.msk.msra.mxu1 %vm3318_vm10, %v2405_v18 }
  0xf7   :  { %2279 = vmatpush3.msra.mxu0 %v3519_v41  ;;  %2280 = vmatprep.mubr.f32.mxu0 %v3377_v53 }
  0xf8   :  { %2308 = vmatprep.subr.msk.mxu1 %vm3340_vm11, %v2405_v18  ;;  %2281 = vmatmul.mubr.f32.vlgmr.msra.gmra.mxu0 %v3385_v39 }
  0xf9   :  { %2309 = vmatpush3.msk.msra.mxu1 %vm3340_vm11, %v2405_v18  ;;  %2283 = vmatprep.mubr.f32.mxu0 %v3543_v28 }
  0xfa   :  { %2310 = vmatprep.subr.msk.mxu1 %vm3370_vm12, %v2405_v18  ;;  %2318 = vmatprep.mubr.f32.mxu1 %v3377_v53 }
  0xfb   :  { %2311 = vmatpush3.msk.msra.mxu1 %vm3370_vm12, %v2405_v18 }
  0xfc   :  { %2312 = vmatprep.subr.msk.mxu1 %vm3392_vm13, %v2405_v18  ;;  %2284 = vmatmul.mubr.f32.gmra.mxu0 %v3547_v36 }
  0xfd   :  { %2313 = vmatpush3.msk.msra.mxu1 %vm3392_vm13, %v2405_v18 }
  0xfe   :  { %2314 = vmatprep.subr.msk.mxu1 %vm3414_vm14, %v2405_v18 }
  0xff   :  { %2315 = vmatpush3.msk.msra.mxu1 %vm3414_vm14, %v2405_v18 }
 0x100   :  { %2316 = vmatprep.subr.msk.mxu1 %vm3440_vm15, %v2405_v18 }
 0x101   :  { %2317 = vmatpush3.msk.msra.mxu1 %vm3440_vm15, %v2405_v18 }
 0x102   :  { %2319 = vmatmul.mubr.f32.vlgmr.msra.gmra.mxu1 %v3385_v39 }
 0x103   :  { %2321 = vmatprep.mubr.f32.mxu1 %v3543_v28 }
 0x105   :  { %v1902_v14 = vpop.f32.mrf.mxu0 }
 0x106   :  { %2322 = vmatmul.mubr.f32.gmra.mxu1 %v3547_v36 }
 0x107   :  { %v212_v16 = vpop.f32.mrf.mxu0 }
 0x10e   :  { %v1940_v45 = vpop.f32.mrf.mxu1 }
 0x10f   :  { %v384_v41 = vadd.f32 %v1940_v45, %v1902_v14 }
 0x110   :  { %v377_v27 = vpop.f32.mrf.mxu1 }
 0x111   :  { %v378_v55 = vadd.f32 %v377_v27, %v212_v16 }
 0x122   :  { %v1905_v20 = vpop.f32.mrf.mxu0 }
 0x124   :  { %v232_v33 = vpop.f32.mrf.mxu0 }
 0x127   :  { %v1978_v52 = vpop.f32.mrf.mxu0 }
 0x128   :  { %v491_v11 = vadd.f32 %v1978_v52, %v384_v41 }
 0x129   :  { %v483_v35 = vpop.f32.mrf.mxu0 }
 0x12a   :  { %v1943_v0 = vpop.f32.mrf.mxu1  ;;  %v484_v23 = vadd.f32 %v483_v35, %v378_v55 }
 0x12b   :  { %v396_v58 = vadd.f32 %v1943_v0, %v1905_v20 }
 0x12c   :  { %v389_v59 = vpop.f32.mrf.mxu1 }
 0x12d   :  { %v390_v6 = vadd.f32 %v389_v59, %v232_v33 }
 0x12e   :  { %v1981_v9 = vpop.f32.mrf.mxu0 }
 0x12f   :  { %v505_v33 = vadd.f32 %v1981_v9, %v396_v58 }
 0x130   :  { %v497_v57 = vpop.f32.mrf.mxu0 }
 0x131   :  { %v498_v10 = vadd.f32 %v497_v57, %v390_v6 }
 0x133   :  { %v2016_v13 = vpop.f32.mrf.mxu1 }
 0x134   :  { %v586_v7 = vadd.f32 %v2016_v13, %v491_v11 }
 0x135   :  { %v577_v47 = vpop.f32.mrf.mxu1 }
 0x136   :  { %v578_v28 = vadd.f32 %v577_v47, %v484_v23 }
 0x139   :  { %v2019_v60 = vpop.f32.mrf.mxu1 }
 0x13b   :  { %v593_v21 = vpop.f32.mrf.mxu1 }
 0x13c   :  { %v594_v45 = vadd.f32 %v593_v21, %v498_v10 }
 0x14c   :  { %v2054_v18 = vpop.f32.mrf.mxu0 }
 0x14d   :  { %v711_v27 = vadd.f32 %v2054_v18, %v586_v7 }
 0x14e   :  { %v704_v8 = vpop.f32.mrf.mxu0 }
 0x14f   :  { %v705_v34 = vadd.f32 %v704_v8, %v578_v28 }
 0x152   :  { %v3832_v38 = vpop.f32.mrf.mxu0 }
 0x154   :  { %v716_v25 = vpop.f32.mrf.mxu0 }
 0x157   :  { %v2092_v42 = vpop.f32.mrf.mxu1 }
 0x158   :  { %v800_v13 = vadd.f32 %v2092_v42, %v711_v27 }
 0x159   :  { %v793_v48 = vpop.f32.mrf.mxu1 }
 0x15a   :  { %v794_v35 = vadd.f32 %v793_v48, %v705_v34 }
 0x15d   :  { %v3834_v39 = vpop.f32.mrf.mxu1 }
 0x15f   :  { %v805_v4 = vpop.f32.mrf.mxu1 }
 0x171   :  { %v2130_v53 = vpop.f32.mrf.mxu0 }
 0x173   :  { %v890_v56 = vpop.f32.mrf.mxu0 }
 0x17a   :  { %v2168_v44 = vpop.f32.mrf.mxu1 }
 0x17b   :  { %v1062_v51 = vadd.f32 %v2168_v44, %v2130_v53 }
 0x17c   :  { %v1055_v29 = vpop.f32.mrf.mxu1 }
 0x17d   :  { %v1056_v24 = vadd.f32 %v1055_v29, %v890_v56  ;;  %v602_v56 = vadd.f32 %v2019_v60, %v505_v33 }
 0x18e   :  { %v2133_v63 = vpop.f32.mrf.mxu0 }
 0x190   :  { %v910_v49 = vpop.f32.mrf.mxu0 }
 0x193   :  { %v2206_v3 = vpop.f32.mrf.mxu0 }
 0x194   :  { %v1169_v2 = vadd.f32 %v2206_v3, %v1062_v51  ;;  %v723_v3 = vadd.f32 %v3832_v38, %v602_v56 }
 0x195   :  { %v1161_v62 = vpop.f32.mrf.mxu0 }
 0x196   :  { %v2171_v31 = vpop.f32.mrf.mxu1  ;;  %v1162_v43 = vadd.f32 %v1161_v62, %v1056_v24 }
 0x197   :  { %v1074_v54 = vadd.f32 %v2171_v31, %v2133_v63  ;;  %v717_v63 = vadd.f32 %v716_v25, %v594_v45  ;;  %v812_v31 = vadd.f32 %v3834_v39, %v723_v3 }
 0x198   :  { %v1067_v1 = vpop.f32.mrf.mxu1 }
 0x199   :  { %v1068_v5 = vadd.f32 %v1067_v1, %v910_v49  ;;  %v806_v9 = vadd.f32 %v805_v4, %v717_v63 }
 0x19a   :  { %v2209_v17 = vpop.f32.mrf.mxu0 }
 0x19b   :  { %v1183_v32 = vadd.f32 %v2209_v17, %v1074_v54 }
 0x19c   :  { %v1175_v37 = vpop.f32.mrf.mxu0 }
 0x19d   :  { %v1176_v46 = vadd.f32 %v1175_v37, %v1068_v5 }
 0x19f   :  { %v2244_v19 = vpop.f32.mrf.mxu1 }
 0x1a0   :  { %v1264_v22 = vadd.f32 %v2244_v19, %v1169_v2 }
 0x1a1   :  { %v1255_v30 = vpop.f32.mrf.mxu1 }
 0x1a2   :  { %v1256_v50 = vadd.f32 %v1255_v30, %v1162_v43 }
 0x1a5   :  { %v2247_v12 = vpop.f32.mrf.mxu1 }
 0x1a6   :  { %v1280_v20 = vadd.f32 %v2247_v12, %v1183_v32 }
 0x1a7   :  { %v1271_v36 = vpop.f32.mrf.mxu1 }
 0x1a8   :  { %v1272_v0 = vadd.f32 %v1271_v36, %v1176_v46 }
 0x1b8   :  { %v2282_v26 = vpop.f32.mrf.mxu0 }
 0x1b9   :  { %v1389_v14 = vadd.f32 %v2282_v26, %v1264_v22 }
 0x1ba   :  { %v1382_v15 = vpop.f32.mrf.mxu0 }
 0x1bb   :  { %v1383_v16 = vadd.f32 %v1382_v15, %v1256_v50 }
 0x1bc   :  { %v2285_v61 = vpop.f32.mrf.mxu0 }
 0x1bd   :  { %v1401_v8 = vadd.f32 %v2285_v61, %v1280_v20 }
 0x1be   :  { %v1394_v59 = vpop.f32.mrf.mxu0 }
 0x1bf   :  { %v1395_v49 = vadd.f32 %v1394_v59, %v1272_v0 }
 0x1c2   :  { %v2320_v40 = vpop.f32.mrf.mxu1 }
 0x1c3   :  { %v1478_v47 = vadd.f32 %v2320_v40, %v1389_v14 }
 0x1c4   :  { %v1471_v52 = vpop.f32.mrf.mxu1 }
 0x1c5   :  { %v1472_v53 = vadd.f32 %v1471_v52, %v1383_v16  ;;  %v1494_v21 = vmul.f32 %v1478_v47, %v800_v13 }
 0x1c6   :  { %v2323_v57 = vpop.f32.mrf.mxu1 }
 0x1c7   :  { %v1493_v44 = vmul.f32 %v1472_v53, %v794_v35  ;;  %v1490_v18 = vadd.f32 %v2323_v57, %v1401_v8 }
 0x1c8   :  { %v1483_v29 = vpop.f32.mrf.mxu1 }
 0x1c9   :  { %v1484_v48 = vadd.f32 %v1483_v29, %v1395_v49  ;;  %v1497_v62 = vadd.f32 %v1494_v21, %v1493_v44  ;;  %v1496_v17 = vmul.f32 %v1490_v18, %v812_v31 }
 0x1cb   :  { %v1495_v1 = vmul.f32 %v1484_v48, %v806_v9 }
 0x1cd   :  { %v1498_v19 = vadd.f32 %v1497_v62, %v1495_v1 }
 0x1cf   :  { %v1499_v60 = vadd.f32 %v1498_v19, %v1496_v17 }
 0x1d1   :  { %v1500_v25 = vrot.slane %v1499_v60, 4 }
 0x1d3   :  { %v1501_v37 = vadd.f32 %v1500_v25, %v1499_v60 }
 0x1d5   :  { %v1502_v42 = vrot.slane %v1501_v37, 2 }
 0x1d7   :  { %v1503_v30 = vadd.f32 %v1502_v42, %v1501_v37 }
 0x1d9   :  { %v1504_v26 = vrot.slane %v1503_v30, 1 }
 0x1db   :  { %v1505_v55 = vadd.f32 %v1504_v26, %v1503_v30 }
 0x1dd   :  { %v1627_v12 = vmul.f32 -1.442695, %v1505_v55 }
 0x1df   :  { %2331 = vpow2.f32 %v1627_v12 }
 0x1ec   :  { %v2332_v38 = vpop.eup %2331 }
 0x1ed   :  { %v1509_v4 = vadd.f32 1.0, %v2332_v38 }
 0x1ef   :  { %2333 = vrcp.f32 %v1509_v4 }
 0x1fc   :  { %v2334_v39 = vpop.eup %2333 }
 0x1fd   :  { %1512 = vst [vmem:[#allocation7] sm:$0x1] %v2334_v39 }
 0x1fe   :  { %2386 = shalt.err (!%p2383_p0)
}
 0x1ff   :  { %1522 = dma.vmem_to_hbm [thread:$0]  %s1520_s28, 16, %s3845_s4, [#allocation4]  }
 0x200   :  { %2399 = dma.done.wait [#allocation4], 16  }
 0x201   :  { %2400 = vsyncadd [#allocation4], 4294967280 }
 0x202   :  { %1526 = vsyncpa [#allocation3], 1 }
 0x203   :  { %1527 = vsyncpa [#allocation6], 1 }
 0x204   :  { %1528 = vsyncpa [#allocation4], 1 }

</bundles_post_ra>
